<compile_context>
chip_gen: v7x
topology: tpu7x:2x2x1
jax: 0.10.0
libtpu: 0.0.40
codegen_flags: <defaults>
</compile_context>

<pallas_src>
import functools

import jax
import jax.numpy as jnp
from jax import lax
from jax.experimental import pallas as pl
from jax.experimental.pallas import tpu as pltpu

LANE = 128


def _round_up(n, m):
    return ((n + m - 1) // m) * m


def _tensorcores_per_device():
    """Best-effort TensorCore count per JAX device (for megacore batch sharding).

    Falls back to 1, which is always correct (single tile) -- just not megacore-
    sharded on dual-core parts if detection fails.
    """
    try:
        kind = (getattr(jax.devices()[0], "device_kind", "") or "").lower()
        if any(tag in kind for tag in ("v4", "v5p", "v7", "7x")):
            return 2
    except Exception:
        pass
    return 1


def _choose_tile(batch, n_cores, max_tile=512):
    """One big tile on single-TC chips; >=1 tile per core on dual-TC chips."""
    per_core = -(-batch // max(n_cores, 1))
    return max(8, min(_round_up(per_core, 8), max_tile))


# ----------------------------------------------------------------------------
# Kernel
# ----------------------------------------------------------------------------
def make_dueling_kernel(n_feature_layers, action_size):
    """Kernel closed over the (static) layer count and action count."""

    def kernel(x_ref, w0_ref, ws_ref, b_ref, out_ref):
        def bias(i):                       # (1, W) f32, static slice
            return b_ref[i : i + 1, :]

        # trunk fc0: raw state width K, bf16 in, f32 accumulate
        h = x_ref[...].astype(jnp.bfloat16)
        h = jnp.maximum(
            jnp.dot(h, w0_ref[...], preferred_element_type=jnp.float32) + bias(0),
            0.0,
        ).astype(jnp.bfloat16)

        # remaining trunk layers + fused [value-hidden | adv-hidden] layer (all ReLU)
        for l in range(n_feature_layers):
            h = jnp.maximum(
                jnp.dot(h, ws_ref[l], preferred_element_type=jnp.float32)
                + bias(l + 1),
                0.0,
            ).astype(jnp.bfloat16)

        # fused block-diagonal output layer: col 0 = value, cols 1..A = advantage
        fused = (
            jnp.dot(h, ws_ref[n_feature_layers], preferred_element_type=jnp.float32)
            + bias(n_feature_layers + 1)
        )                                                      # (TB, W) f32

        value = fused[:, 0:1]                                  # (TB, 1)
        col = lax.broadcasted_iota(jnp.int32, fused.shape, 1)
        adv_mask = (col >= 1) & (col <= action_size)           # cols 1..A
        adv_max = jnp.max(
            jnp.where(adv_mask, fused, jnp.float32(-1e30)), axis=1, keepdims=True
        )
        # cols 1..A hold q-values; padding cols/rows are garbage, sliced off outside.
        out_ref[...] = (value + (fused - adv_max)).astype(out_ref.dtype)

    return kernel


@functools.partial(
    jax.jit, static_argnames=("n_feature_layers", "action_size", "tb")
)
def dueling_dqn_forward(x, w0, w_stack, b_all, n_feature_layers, action_size, tb):
    """x: (B, state_size) f32; (w0, w_stack, b_all) from pack_params()."""
    b, s = x.shape
    w_dim = w_stack.shape[-1]                 # common padded width W
    num_tiles = pl.cdiv(b, tb)

    kernel = make_dueling_kernel(n_feature_layers, action_size)
    q_slab = pl.pallas_call(
        kernel,
        out_shape=jax.ShapeDtypeStruct((num_tiles * tb, w_dim), jnp.bfloat16),
        grid=(num_tiles,),
        in_specs=[
            pl.BlockSpec((tb, s), lambda i: (i, 0)),              # activations
            pl.BlockSpec(w0.shape, lambda i: (0, 0)),             # fc0 weight
            pl.BlockSpec(w_stack.shape, lambda i: (0, 0, 0)),     # stacked weights
            pl.BlockSpec(b_all.shape, lambda i: (0, 0)),          # stacked biases
        ],
        out_specs=pl.BlockSpec((tb, w_dim), lambda i: (i, 0)),
        compiler_params=pltpu.CompilerParams(
            dimension_semantics=("parallel",),
        ),
    )(x, w0, w_stack, b_all)

    # lane-dense slab -> logical (B, A)
    return q_slab[:b, 1 : 1 + action_size].astype(jnp.float32)


# ----------------------------------------------------------------------------
# Parameter construction (PyTorch-equivalent init) + packing for the kernel
# ----------------------------------------------------------------------------
def _make_linear(key, fan_in, fan_out):
    """PyTorch-style uniform(-1/sqrt(fan_in), 1/sqrt(fan_in)) init."""
    kw, kb = jax.random.split(key)
    bound = 1.0 / jnp.sqrt(jnp.float32(fan_in))
    w = jax.random.uniform(kw, (fan_in, fan_out), jnp.float32, -bound, bound)
    b = jax.random.uniform(kb, (1, fan_out), jnp.float32, -bound, bound)
    return w, b


def build_params(key, state_size, action_size, layers):
    """Raw f32 (W, b) pairs matching DuelingDQNType2.__init__ ordering."""
    feat_dims = [state_size] + list(layers[:-1])
    n_feature_layers = len(feat_dims) - 1
    keys = jax.random.split(key, n_feature_layers + 4)
    raw, k = [], 0
    for i in range(n_feature_layers):
        raw.append(_make_linear(keys[k], feat_dims[i], feat_dims[i + 1])); k += 1
    raw.append(_make_linear(keys[k], layers[-2], layers[-1])); k += 1  # value fc1
    raw.append(_make_linear(keys[k], layers[-1], 1)); k += 1           # value out
    raw.append(_make_linear(keys[k], layers[-2], layers[-1])); k += 1  # adv fc1
    raw.append(_make_linear(keys[k], layers[-1], action_size)); k += 1 # adv out
    return raw, n_feature_layers


def pack_params(raw, n_feature_layers, action_size):
    """Zero-pad to a common lane-aligned width W, fuse streams, stack operands."""
    trunk = raw[:n_feature_layers]
    (wv1, bv1), (wv2, bv2), (wa1, ba1), (wa2, ba2) = raw[n_feature_layers:]
    hv = wv1.shape[1]

    # common padded width for all hidden activations / fused head / output slab
    w_dim = LANE
    for w, _ in trunk:
        w_dim = max(w_dim, _round_up(w.shape[1], LANE))
    w_dim = max(w_dim, _round_up(wv1.shape[0], LANE))      # layers[-2]
    w_dim = max(w_dim, _round_up(2 * hv, LANE))             # fused hidden block
    w_dim = max(w_dim, _round_up(1 + action_size, LANE))    # fused output block

    def pad_bias(b):
        return jnp.zeros((w_dim,), jnp.float32).at[: b.shape[-1]].set(b.reshape(-1))

    # trunk fc0 stays a separate (state_size, W) operand (its K differs)
    w0_raw, b0_raw = trunk[0]
    s = w0_raw.shape[0]
    w0 = (
        jnp.zeros((s, w_dim), jnp.float32)
        .at[:, : w0_raw.shape[1]].set(w0_raw)
        .astype(jnp.bfloat16)
    )

    stack, biases = [], [pad_bias(b0_raw)]

    # remaining trunk layers: (W, W)
    for w, b in trunk[1:]:
        fi, fo = w.shape
        stack.append(jnp.zeros((w_dim, w_dim), jnp.float32).at[:fi, :fo].set(w))
        biases.append(pad_bias(b))

    # fused head hidden layer: [ value-hidden cols 0..hv-1 | adv-hidden cols hv..2hv-1 ]
    fin = wv1.shape[0]
    w1 = jnp.zeros((w_dim, w_dim), jnp.float32)
    w1 = w1.at[:fin, :hv].set(wv1).at[:fin, hv : 2 * hv].set(wa1)
    b1 = jnp.zeros((w_dim,), jnp.float32)
    b1 = b1.at[:hv].set(bv1[0]).at[hv : 2 * hv].set(ba1[0])
    stack.append(w1); biases.append(b1)

    # fused head output layer (block-diagonal): col 0 = value, cols 1..A = advantage
    a = action_size
    w2 = jnp.zeros((w_dim, w_dim), jnp.float32)
    w2 = w2.at[:hv, 0:1].set(wv2).at[hv : 2 * hv, 1 : 1 + a].set(wa2)
    b2 = jnp.zeros((w_dim,), jnp.float32)
    b2 = b2.at[0:1].set(bv2[0]).at[1 : 1 + a].set(ba2[0])
    stack.append(w2); biases.append(b2)

    w_stack = jnp.stack(stack).astype(jnp.bfloat16)          # (n_feat + 1, W, W)
    b_all = jnp.stack(biases)                                 # (n_feat + 2, W) f32
    return w0, w_stack, b_all


def reference_forward(x, raw, n_feature_layers):
    """Plain-JAX f32 reference with the un-fused, un-padded params."""
    h = x
    for w, b in raw[:n_feature_layers]:
        h = jnp.maximum(h @ w + b, 0.0)
    (wv1, bv1), (wv2, bv2), (wa1, ba1), (wa2, ba2) = raw[n_feature_layers:]
    v_h = jnp.maximum(h @ wv1 + bv1, 0.0)
    value = v_h @ wv2 + bv2
    a_h = jnp.maximum(h @ wa1 + ba1, 0.0)
    adv = a_h @ wa2 + ba2
    return value + (adv - jnp.max(adv, axis=1, keepdims=True))


# TODO(synk): batch_norm / dropout branches of the module (off by default) are not
# implemented in the kernel.
if __name__ == "__main__":
    key = jax.random.PRNGKey(0)
    k_x, k_p = jax.random.split(key)

    # small shapes consistent with the module; batch deliberately NOT a power of
    # two / tile multiple to exercise the ragged-tile path.
    batch, state_size, action_size = 200, 16, 4
    layers = [32, 32, 32]

    x = jax.random.normal(k_x, (batch, state_size), jnp.float32)
    raw, n_feat = build_params(k_p, state_size, action_size, layers)
    w0, w_stack, b_all = pack_params(raw, n_feat, action_size)

    n_cores = _tensorcores_per_device()
    tb = _choose_tile(batch, n_cores)

    q = dueling_dqn_forward(x, w0, w_stack, b_all, n_feat, action_size, tb)
    q = jax.block_until_ready(q)

    q_ref = reference_forward(x, raw, n_feat)
    assert q.shape == (batch, action_size)
    # bf16 weights/activations/output with f32 accumulation -> loosened tolerance
    max_err = float(jnp.max(jnp.abs(q - q_ref)))
    assert jnp.allclose(q, q_ref, atol=5e-2, rtol=5e-2), (
        f"mismatch vs reference: max abs err {max_err:.4f}"
    )

    print("KERNEL_OK")
</pallas_src>

<mosaic_0001>
module attributes {stable_mosaic.version = 11 : i64} {
  func.func @kernel(%arg0: i32, %arg1: memref<200x16xf32, #tpu.memory_space<vmem>>, %arg2: memref<16x128xbf16, #tpu.memory_space<vmem>>, %arg3: memref<3x128x128xbf16, #tpu.memory_space<vmem>>, %arg4: memref<4x128xf32, #tpu.memory_space<vmem>>, %arg5: memref<200x128xbf16, #tpu.memory_space<vmem>>) attributes {dimension_semantics = [#tpu.dimension_semantics<parallel>], iteration_bounds = array<i64: 1>, scalar_prefetch = 0 : i64, scratch_operands = 0 : i64, tpu.core_type = #tpu.core_type<tc>, window_params = [{transform_indices = @transform_0, window_bounds = array<i64: 200, 16>}, {pipeline_mode = #tpu.pipeline_mode<synchronous>, transform_indices = @transform_1, window_bounds = array<i64: 16, 128>}, {pipeline_mode = #tpu.pipeline_mode<synchronous>, transform_indices = @transform_2, window_bounds = array<i64: 3, 128, 128>}, {pipeline_mode = #tpu.pipeline_mode<synchronous>, transform_indices = @transform_3, window_bounds = array<i64: 4, 128>}, {transform_indices = @transform_4, window_bounds = array<i64: 200, 128>}]} {
    %c0 = arith.constant 0 : index
    %c0_0 = arith.constant 0 : index
    %0 = vector.load %arg1[%c0, %c0_0] : memref<200x16xf32, #tpu.memory_space<vmem>>, vector<200x16xf32>
    %1 = arith.truncf %0 : vector<200x16xf32> to vector<200x16xbf16>
    %c0_1 = arith.constant 0 : index
    %c0_2 = arith.constant 0 : index
    %2 = vector.load %arg2[%c0_1, %c0_2] : memref<16x128xbf16, #tpu.memory_space<vmem>>, vector<16x128xbf16>
    %cst = arith.constant dense<0.000000e+00> : vector<200x128xf32>
    %3 = tpu.matmul %1, %2, %cst {dimension_numbers = #tpu.dot_dimension_numbers<[1], [0], [0], [1], [0, 0, 1, 1], [], []>} : vector<200x16xbf16>, vector<16x128xbf16>, vector<200x128xf32> -> vector<200x128xf32>
    %c0_3 = arith.constant 0 : index
    %c0_4 = arith.constant 0 : index
    %4 = vector.load %arg4[%c0_3, %c0_4] : memref<4x128xf32, #tpu.memory_space<vmem>>, vector<1x128xf32>
    %5 = vector.broadcast %4 : vector<1x128xf32> to vector<200x128xf32>
    %6 = arith.addf %3, %5 : vector<200x128xf32>
    %cst_5 = arith.constant 0.000000e+00 : f32
    %7 = vector.broadcast %cst_5 : f32 to vector<200x128xf32>
    %8 = arith.maximumf %6, %7 : vector<200x128xf32>
    %9 = arith.truncf %8 : vector<200x128xf32> to vector<200x128xbf16>
    %c0_6 = arith.constant 0 : index
    %c0_7 = arith.constant 0 : index
    %c0_8 = arith.constant 0 : index
    %10 = vector.load %arg3[%c0_6, %c0_7, %c0_8] : memref<3x128x128xbf16, #tpu.memory_space<vmem>>, vector<1x128x128xbf16>
    %11 = vector.shape_cast %10 : vector<1x128x128xbf16> to vector<128x128xbf16>
    %cst_9 = arith.constant dense<0.000000e+00> : vector<200x128xf32>
    %12 = tpu.matmul %9, %11, %cst_9 {dimension_numbers = #tpu.dot_dimension_numbers<[1], [0], [0], [1], [0, 0, 1, 1], [], []>} : vector<200x128xbf16>, vector<128x128xbf16>, vector<200x128xf32> -> vector<200x128xf32>
    %c1 = arith.constant 1 : index
    %c0_10 = arith.constant 0 : index
    %13 = vector.load %arg4[%c1, %c0_10] : memref<4x128xf32, #tpu.memory_space<vmem>>, vector<1x128xf32>
    %14 = vector.broadcast %13 : vector<1x128xf32> to vector<200x128xf32>
    %15 = arith.addf %12, %14 : vector<200x128xf32>
    %cst_11 = arith.constant 0.000000e+00 : f32
    %16 = vector.broadcast %cst_11 : f32 to vector<200x128xf32>
    %17 = arith.maximumf %15, %16 : vector<200x128xf32>
    %18 = arith.truncf %17 : vector<200x128xf32> to vector<200x128xbf16>
    %c1_12 = arith.constant 1 : index
    %c0_13 = arith.constant 0 : index
    %c0_14 = arith.constant 0 : index
    %19 = vector.load %arg3[%c1_12, %c0_13, %c0_14] : memref<3x128x128xbf16, #tpu.memory_space<vmem>>, vector<1x128x128xbf16>
    %20 = vector.shape_cast %19 : vector<1x128x128xbf16> to vector<128x128xbf16>
    %cst_15 = arith.constant dense<0.000000e+00> : vector<200x128xf32>
    %21 = tpu.matmul %18, %20, %cst_15 {dimension_numbers = #tpu.dot_dimension_numbers<[1], [0], [0], [1], [0, 0, 1, 1], [], []>} : vector<200x128xbf16>, vector<128x128xbf16>, vector<200x128xf32> -> vector<200x128xf32>
    %c2 = arith.constant 2 : index
    %c0_16 = arith.constant 0 : index
    %22 = vector.load %arg4[%c2, %c0_16] : memref<4x128xf32, #tpu.memory_space<vmem>>, vector<1x128xf32>
    %23 = vector.broadcast %22 : vector<1x128xf32> to vector<200x128xf32>
    %24 = arith.addf %21, %23 : vector<200x128xf32>
    %cst_17 = arith.constant 0.000000e+00 : f32
    %25 = vector.broadcast %cst_17 : f32 to vector<200x128xf32>
    %26 = arith.maximumf %24, %25 : vector<200x128xf32>
    %27 = arith.truncf %26 : vector<200x128xf32> to vector<200x128xbf16>
    %c2_18 = arith.constant 2 : index
    %c0_19 = arith.constant 0 : index
    %c0_20 = arith.constant 0 : index
    %28 = vector.load %arg3[%c2_18, %c0_19, %c0_20] : memref<3x128x128xbf16, #tpu.memory_space<vmem>>, vector<1x128x128xbf16>
    %29 = vector.shape_cast %28 : vector<1x128x128xbf16> to vector<128x128xbf16>
    %cst_21 = arith.constant dense<0.000000e+00> : vector<200x128xf32>
    %30 = tpu.matmul %27, %29, %cst_21 {dimension_numbers = #tpu.dot_dimension_numbers<[1], [0], [0], [1], [0, 0, 1, 1], [], []>} : vector<200x128xbf16>, vector<128x128xbf16>, vector<200x128xf32> -> vector<200x128xf32>
    %c3 = arith.constant 3 : index
    %c0_22 = arith.constant 0 : index
    %31 = vector.load %arg4[%c3, %c0_22] : memref<4x128xf32, #tpu.memory_space<vmem>>, vector<1x128xf32>
    %32 = vector.broadcast %31 : vector<1x128xf32> to vector<200x128xf32>
    %33 = arith.addf %30, %32 : vector<200x128xf32>
    %34 = vector.extract_strided_slice %33 {offsets = [0, 0], sizes = [200, 1], strides = [1, 1]} : vector<200x128xf32> to vector<200x1xf32>
    %35 = tpu.iota {dimensions = array<i32: 1>} : vector<200x128xi32>
    %c1_i32 = arith.constant 1 : i32
    %36 = vector.broadcast %c1_i32 : i32 to vector<200x128xi32>
    %37 = arith.cmpi sge, %35, %36 : vector<200x128xi32>
    %c4_i32 = arith.constant 4 : i32
    %38 = vector.broadcast %c4_i32 : i32 to vector<200x128xi32>
    %39 = arith.cmpi sle, %35, %38 : vector<200x128xi32>
    %40 = arith.andi %37, %39 : vector<200x128xi1>
    %cst_23 = arith.constant -1.000000e+30 : f32
    %41 = vector.broadcast %cst_23 : f32 to vector<200x128xf32>
    %42 = arith.select %40, %33, %41 : vector<200x128xi1>, vector<200x128xf32>
    %cst_24 = arith.constant dense<0xFF800000> : vector<200xf32>
    %43 = vector.multi_reduction <maximumf>, %42, %cst_24 [1] : vector<200x128xf32> to vector<200xf32>
    %44 = vector.shape_cast %43 : vector<200xf32> to vector<200x1xf32>
    %45 = vector.broadcast %44 : vector<200x1xf32> to vector<200x128xf32>
    %46 = arith.subf %33, %45 : vector<200x128xf32>
    %47 = vector.broadcast %34 : vector<200x1xf32> to vector<200x128xf32>
    %48 = arith.addf %47, %46 : vector<200x128xf32>
    %49 = arith.truncf %48 : vector<200x128xf32> to vector<200x128xbf16>
    %c0_25 = arith.constant 0 : index
    %c0_26 = arith.constant 0 : index
    %50 = vector.load %arg5[%c0_25, %c0_26] : memref<200x128xbf16, #tpu.memory_space<vmem>>, vector<200x128xbf16>
    tpu.vector_store %arg5[%c0_25, %c0_26], %49 {strides = array<i32>} : memref<200x128xbf16, #tpu.memory_space<vmem>>, vector<200x128xbf16>,
    return
  }
  func.func @transform_0(%arg0: i32) -> (i32, i32) {
    %c0_i32 = arith.constant 0 : i32
    %c0_i32_0 = arith.constant 0 : i32
    return %arg0, %c0_i32 : i32, i32
  }
  func.func @transform_1(%arg0: i32) -> (i32, i32) {
    %c0_i32 = arith.constant 0 : i32
    %c0_i32_0 = arith.constant 0 : i32
    %c0_i32_1 = arith.constant 0 : i32
    return %c0_i32, %c0_i32_0 : i32, i32
  }
  func.func @transform_2(%arg0: i32) -> (i32, i32, i32) {
    %c0_i32 = arith.constant 0 : i32
    %c0_i32_0 = arith.constant 0 : i32
    %c0_i32_1 = arith.constant 0 : i32
    %c0_i32_2 = arith.constant 0 : i32
    return %c0_i32, %c0_i32_0, %c0_i32_1 : i32, i32, i32
  }
  func.func @transform_3(%arg0: i32) -> (i32, i32) {
    %c0_i32 = arith.constant 0 : i32
    %c0_i32_0 = arith.constant 0 : i32
    %c0_i32_1 = arith.constant 0 : i32
    return %c0_i32, %c0_i32_0 : i32, i32
  }
  func.func @transform_4(%arg0: i32) -> (i32, i32) {
    %c0_i32 = arith.constant 0 : i32
    %c0_i32_0 = arith.constant 0 : i32
    return %arg0, %c0_i32 : i32, i32
  }
}

</mosaic_0001>

<bundles_post_ra>
// kernel: dueling_dqn_forward.1
= control target key start
LH: loop header
LB: loop body
LE: loop exit
PB: predicated region body
PF: predicated region fallthrough
CT: control target
= control target key end

     0   :  { %v1937_v0 = vmov 0.0   ;;  %vm1938_vm0 = vmmov 0   ;;  %vm69_vm1 = vcmask 130048   ;;  %s2632_s1 = inlined_call_operand.vmem [shape: bf16[16,128], index: 1, kind: input, shape index: {}]   ;;  %s2633_s0 = inlined_call_operand.vmem [shape: f32[200,16], index: 0, kind: input, shape index: {}]   ;;  %s2634_s2 = inlined_call_operand.vmem [shape: bf16[3,128,128], index: 2, kind: input, shape index: {}]   ;;  %s2635_s3 = inlined_call_operand.vmem [shape: f32[4,128], index: 3, kind: input, shape index: {}]   ;;  %s2636_s4 = inlined_call_operand.vmem [shape: bf16[200,128], index: 4, kind: output, shape index: {}]  }
   0x1   :  { %1633 = vmatprep.subr.bf16.mxu0 %v1937_v0  ;;  %v1912_v1 = vld [vmem:[%s2632_s1] sm:$0xff]   ;;  %1635 = vmatprep.mubr.msk.bf16.mxu0 %vm1938_vm0, %v1937_v0  ;;  %v19_v3 = vld [vmem:[%s2633_s0 + $0x8] sm:$0xff]  ;;  %v20_v5 = vld [vmem:[%s2633_s0 + $0x10] sm:$0xff] }
   0x2   :  { %v18_v2 = vld [vmem:[%s2633_s0] sm:$0xff]  ;;  %1687 = vmatprep.subr.bf16.mxu1 %v1937_v0  ;;  %1703 = vmatprep.mubr.msk.bf16.mxu1 %vm1938_vm0, %v1937_v0  ;;  %v21_v6 = vld [vmem:[%s2633_s0 + $0x18] sm:$0xff]  ;;  %v1914_v9 = vld [vmem:[%s2634_s2 + $0x8] sm:$0xff]  }
   0x3   :  { %1634 = vmatpush3.bf16.msra.mxu0 %v1912_v1  ;;  %v43_v4 = vpack.c.bf16 %v19_v3, %v18_v2  ;;  %v1913_v7 = vld [vmem:[%s2634_s2] sm:$0xff]   ;;  %v44_v8 = vpack.c.bf16 %v21_v6, %v20_v5  ;;  %v23_v11 = vld [vmem:[%s2633_s0 + $0x28] sm:$0xff]  ;;  %v1915_v12 = vld [vmem:[%s2634_s2 + $0x10] sm:$0xff]  }
   0x4   :  { %1755 = vmatprep.subr.bf16.mxu0 %v1937_v0  ;;  %1688 = vmatpush3.bf16.msra.mxu1 %v1913_v7  ;;  %v22_v10 = vld [vmem:[%s2633_s0 + $0x20] sm:$0xff]  ;;  %v1916_v13 = vld [vmem:[%s2634_s2 + $0x18] sm:$0xff]   ;;  %v24_v15 = vld [vmem:[%s2633_s0 + $0x30] sm:$0xff] }
   0x5   :  { %1689 = vmatprep.subr.bf16.mxu1 %v1937_v0  ;;  %v45_v14 = vpack.c.bf16 %v23_v11, %v22_v10  ;;  %v25_v16 = vld [vmem:[%s2633_s0 + $0x38] sm:$0xff]  ;;  %v1917_v17 = vld [vmem:[%s2634_s2 + $0x20] sm:$0xff]   ;;  %v1918_v18 = vld [vmem:[%s2634_s2 + $0x28] sm:$0xff]  }
   0x6   :  { %1636 = vmatmul.mubr.msk.bf16.vlgmr.msra.gmra.mrb[0].mxu0 %vm69_vm1, %v43_v4  ;;  %v46_v19 = vpack.c.bf16 %v25_v16, %v24_v15  ;;  %v26_v20 = vld [vmem:[%s2633_s0 + $0x40] sm:$0xff]  ;;  %v27_v21 = vld [vmem:[%s2633_s0 + $0x48] sm:$0xff]  ;;  %v28_v23 = vld [vmem:[%s2633_s0 + $0x50] sm:$0xff] }
   0x7   :  { %1639 = vmatprep.mubr.msk.bf16.mxu0 %vm1938_vm0, %v1937_v0  ;;  %v47_v22 = vpack.c.bf16 %v27_v21, %v26_v20  ;;  %v29_v24 = vld [vmem:[%s2633_s0 + $0x58] sm:$0xff]  ;;  %v30_v26 = vld [vmem:[%s2633_s0 + $0x60] sm:$0xff]  ;;  %v31_v27 = vld [vmem:[%s2633_s0 + $0x68] sm:$0xff] }
   0x8   :  { %1690 = vmatpush3.bf16.msra.mxu1 %v1914_v9  ;;  %v48_v25 = vpack.c.bf16 %v29_v24, %v28_v23  ;;  %v49_v28 = vpack.c.bf16 %v31_v27, %v30_v26  ;;  %v32_v29 = vld [vmem:[%s2633_s0 + $0x70] sm:$0xff]  ;;  %v33_v30 = vld [vmem:[%s2633_s0 + $0x78] sm:$0xff]  ;;  %v34_v32 = vld [vmem:[%s2633_s0 + $0x80] sm:$0xff] }
   0x9   :  { %1691 = vmatprep.subr.bf16.mxu1 %v1937_v0  ;;  %v50_v31 = vpack.c.bf16 %v33_v30, %v32_v29  ;;  %v35_v33 = vld [vmem:[%s2633_s0 + $0x88] sm:$0xff]  ;;  %v36_v35 = vld [vmem:[%s2633_s0 + $0x90] sm:$0xff]  ;;  %v37_v36 = vld [vmem:[%s2633_s0 + $0x98] sm:$0xff] }
   0xa   :  { %v51_v34 = vpack.c.bf16 %v35_v33, %v34_v32  ;;  %v52_v37 = vpack.c.bf16 %v37_v36, %v36_v35  ;;  %v38_v38 = vld [vmem:[%s2633_s0 + $0xa0] sm:$0xff]  ;;  %v39_v39 = vld [vmem:[%s2633_s0 + $0xa8] sm:$0xff]  ;;  %v40_v41 = vld [vmem:[%s2633_s0 + $0xb0] sm:$0xff] }
   0xb   :  { %v53_v40 = vpack.c.bf16 %v39_v39, %v38_v38  ;;  %v41_v42 = vld [vmem:[%s2633_s0 + $0xb8] sm:$0xff]  ;;  %v1919_v43 = vld [vmem:[%s2634_s2 + $0x30] sm:$0xff]   ;;  %v42_v46 = vld [vmem:[%s2633_s0 + $0xc0] sm:$0xff] }
   0xc   :  { %1692 = vmatpush3.bf16.msra.mxu1 %v1915_v12  ;;  %v54_v44 = vpack.c.bf16 %v41_v42, %v40_v41  ;;  %v1920_v45 = vld [vmem:[%s2634_s2 + $0x38] sm:$0xff]   ;;  %v55_v47 = vpack.c.bf16 %v42_v46, %v42_v46  ;;  %v1921_v48 = vld [vmem:[%s2634_s2 + $0x40] sm:$0xff]   ;;  %v1922_v49 = vld [vmem:[%s2634_s2 + $0x48] sm:$0xff]  }
   0xd   :  { %1693 = vmatprep.subr.bf16.mxu1 %v1937_v0  ;;  %1756 = vmatpush3.bf16.msra.mxu0 %v1921_v48  ;;  %v1923_v50 = vld [vmem:[%s2634_s2 + $0x50] sm:$0xff]   ;;  %v1924_v51 = vld [vmem:[%s2634_s2 + $0x58] sm:$0xff]   ;;  %v1925_v52 = vld [vmem:[%s2634_s2 + $0x60] sm:$0xff]  }
   0xe   :  { %1640 = vmatmul.mubr.msk.bf16.gmra.mrb[4].mxu0 %vm69_vm1, %v44_v8  ;;  %1757 = vmatprep.subr.bf16.mxu0 %v1937_v0  ;;  %v1926_v53 = vld [vmem:[%s2634_s2 + $0x68] sm:$0xff]   ;;  %v1927_v54 = vld [vmem:[%s2634_s2 + $0x70] sm:$0xff]   ;;  %v1928_v55 = vld [vmem:[%s2634_s2 + $0x78] sm:$0xff]  }
   0xf   :  { %1643 = vmatprep.mubr.msk.bf16.mxu0 %vm1938_vm0, %v1937_v0  ;;  %v2156_v56 = vld [vmem:[%s2635_s3] ss:$0 sm:$0xff] }
  0x10   :  { %1694 = vmatpush3.bf16.msra.mxu1 %v1916_v13 }
  0x11   :  { %1695 = vmatprep.subr.bf16.mxu1 %v1937_v0  ;;  %1758 = vmatpush3.bf16.msra.mxu0 %v1922_v49 }
  0x12   :  { %1759 = vmatprep.subr.bf16.mxu0 %v1937_v0 }
  0x14   :  { %1696 = vmatpush3.bf16.msra.mxu1 %v1917_v17 }
  0x15   :  { %1697 = vmatprep.subr.bf16.mxu1 %v1937_v0  ;;  %1760 = vmatpush3.bf16.msra.mxu0 %v1923_v50 }
  0x16   :  { %1644 = vmatmul.mubr.msk.bf16.gmra.mrb[8].mxu0 %vm69_vm1, %v45_v14  ;;  %1761 = vmatprep.subr.bf16.mxu0 %v1937_v0 }
  0x17   :  { %1647 = vmatprep.mubr.msk.bf16.mxu0 %vm1938_vm0, %v1937_v0 }
  0x18   :  { %1698 = vmatpush3.bf16.msra.mxu1 %v1918_v18 }
  0x19   :  { %1699 = vmatprep.subr.bf16.mxu1 %v1937_v0  ;;  %1762 = vmatpush3.bf16.msra.mxu0 %v1924_v51 }
  0x1a   :  { %1763 = vmatprep.subr.bf16.mxu0 %v1937_v0 }
  0x1c   :  { %1700 = vmatpush3.bf16.msra.mxu1 %v1919_v43 }
  0x1d   :  { %1701 = vmatprep.subr.bf16.mxu1 %v1937_v0  ;;  %1764 = vmatpush3.bf16.msra.mxu0 %v1925_v52 }
  0x1e   :  { %1648 = vmatmul.mubr.msk.bf16.gmra.mrb[12].mxu0 %vm69_vm1, %v46_v19  ;;  %1765 = vmatprep.subr.bf16.mxu0 %v1937_v0 }
  0x1f   :  { %1651 = vmatprep.mubr.msk.bf16.mxu0 %vm1938_vm0, %v1937_v0 }
  0x20   :  { %1702 = vmatpush3.bf16.msra.mxu1 %v1920_v45 }
  0x21   :  { %1891 = vmatprep.subr.bf16.mxu1 %v1937_v0  ;;  %1766 = vmatpush3.bf16.msra.mxu0 %v1926_v53 }
  0x22   :  { %1767 = vmatprep.subr.bf16.mxu0 %v1937_v0 }
  0x25   :  { %1768 = vmatpush3.bf16.msra.mxu0 %v1927_v54 }
  0x26   :  { %1652 = vmatmul.mubr.msk.bf16.gmra.mrb[16].mxu0 %vm69_vm1, %v47_v22  ;;  %1769 = vmatprep.subr.bf16.mxu0 %v1937_v0 }
  0x27   :  { %1655 = vmatprep.mubr.msk.bf16.mxu0 %vm1938_vm0, %v1937_v0 }
  0x29   :  { %1770 = vmatpush3.bf16.msra.mxu0 %v1928_v55 }
  0x2a   :  { %1823 = vmatprep.subr.bf16.mxu0 %v1937_v0 }
  0x2e   :  { %1656 = vmatmul.mubr.msk.bf16.gmra.mrb[20].mxu0 %vm69_vm1, %v48_v25 }
  0x2f   :  { %1659 = vmatprep.mubr.msk.bf16.mxu0 %vm1938_vm0, %v1937_v0 }
  0x36   :  { %1660 = vmatmul.mubr.msk.bf16.gmra.mrb[24].mxu0 %vm69_vm1, %v49_v28 }
  0x37   :  { %1663 = vmatprep.mubr.msk.bf16.mxu0 %vm1938_vm0, %v1937_v0 }
  0x3e   :  { %1664 = vmatmul.mubr.msk.bf16.gmra.mrb[28].mxu0 %vm69_vm1, %v50_v31 }
  0x3f   :  { %1667 = vmatprep.mubr.msk.bf16.mxu0 %vm1938_vm0, %v1937_v0 }
  0x46   :  { %1668 = vmatmul.mubr.msk.bf16.gmra.mrb[32].mxu0 %vm69_vm1, %v51_v34 }
  0x47   :  { %1671 = vmatprep.mubr.msk.bf16.mxu0 %vm1938_vm0, %v1937_v0 }
  0x4e   :  { %1672 = vmatmul.mubr.msk.bf16.gmra.mrb[36].mxu0 %vm69_vm1, %v52_v37 }
  0x4f   :  { %1675 = vmatprep.mubr.msk.bf16.mxu0 %vm1938_vm0, %v1937_v0 }
  0x56   :  { %1676 = vmatmul.mubr.msk.bf16.gmra.mrb[40].mxu0 %vm69_vm1, %v53_v40 }
  0x57   :  { %1679 = vmatprep.mubr.msk.bf16.mxu0 %vm1938_vm0, %v1937_v0 }
  0x5e   :  { %1680 = vmatmul.mubr.msk.bf16.gmra.mrb[44].mxu0 %vm69_vm1, %v54_v44 }
  0x5f   :  { %1683 = vmatprep.mubr.msk.bf16.mxu0 %vm1938_vm0, %v1937_v0 }
  0x66   :  { %1684 = vmatmul.mubr.msk.bf16.gmra.mrb[48].mxu0 %vm69_vm1, %v55_v47 }
  0x67   :  { %1771 = vmatprep.mubr.msk.bf16.mxu0 %vm1938_vm0, %v1937_v0 }
  0xd9   :  { %v143_v57 = vpop.f32.mrb[0].mxu0 }
  0xda   :  { %v144_v58 = vadd.f32 %v2156_v56, %v143_v57  ;;  %v1637_v59 = vpop.f32.mrb[1].mxu0 }
  0xdb   :  { %v146_v60 = vpop.f32.mrb[2].mxu0 }
  0xdc   :  { %v147_v61 = vadd.f32 %v2156_v56, %v146_v60  ;;  %v1638_v62 = vpop.f32.mrb[3].mxu0  ;;  %v245_v63 = vmax.f32 %v144_v58, 0.0 }
  0xde   :  { %v246_v1 = vmax.f32 %v147_v61, 0.0 }
  0xe0   :  { %v270_v2 = vpack.c.bf16 %v246_v1, %v245_v63 }
  0xe1   :  { %v151_v3 = vpop.f32.mrb[4].mxu0 }
  0xe2   :  { %v152_v4 = vadd.f32 %v2156_v56, %v151_v3  ;;  %v1641_v5 = vpop.f32.mrb[5].mxu0  ;;  %1704 = vmatmul.mubr.bf16.vlgmr.msra.gmra.mrb[0].mxu1 %v270_v2 }
  0xe3   :  { %v154_v6 = vpop.f32.mrb[6].mxu0  ;;  %1707 = vmatprep.mubr.msk.bf16.mxu1 %vm1938_vm0, %v1937_v0 }
  0xe4   :  { %v155_v7 = vadd.f32 %v2156_v56, %v154_v6  ;;  %v1642_v8 = vpop.f32.mrb[7].mxu0  ;;  %v247_v9 = vmax.f32 %v152_v4, 0.0 }
  0xe6   :  { %v248_v10 = vmax.f32 %v155_v7, 0.0 }
  0xe8   :  { %v271_v11 = vpack.c.bf16 %v248_v10, %v247_v9 }
  0xe9   :  { %v159_v12 = vpop.f32.mrb[8].mxu0 }
  0xea   :  { %1708 = vmatmul.mubr.bf16.gmra.mrb[4].mxu1 %v271_v11  ;;  %v160_v13 = vadd.f32 %v2156_v56, %v159_v12  ;;  %v1645_v14 = vpop.f32.mrb[9].mxu0 }
  0xeb   :  { %v162_v15 = vpop.f32.mrb[10].mxu0  ;;  %1711 = vmatprep.mubr.msk.bf16.mxu1 %vm1938_vm0, %v1937_v0 }
  0xec   :  { %v249_v16 = vmax.f32 %v160_v13, 0.0  ;;  %v163_v17 = vadd.f32 %v2156_v56, %v162_v15  ;;  %v1646_v18 = vpop.f32.mrb[11].mxu0 }
  0xee   :  { %v250_v19 = vmax.f32 %v163_v17, 0.0 }
  0xf0   :  { %v272_v20 = vpack.c.bf16 %v250_v19, %v249_v16 }
  0xf1   :  { %v167_v21 = vpop.f32.mrb[12].mxu0 }
  0xf2   :  { %v168_v22 = vadd.f32 %v2156_v56, %v167_v21  ;;  %v1649_v23 = vpop.f32.mrb[13].mxu0  ;;  %1712 = vmatmul.mubr.bf16.gmra.mrb[8].mxu1 %v272_v20 }
  0xf3   :  { %v170_v24 = vpop.f32.mrb[14].mxu0  ;;  %1715 = vmatprep.mubr.msk.bf16.mxu1 %vm1938_vm0, %v1937_v0 }
  0xf4   :  { %v251_v25 = vmax.f32 %v168_v22, 0.0  ;;  %v171_v26 = vadd.f32 %v2156_v56, %v170_v24  ;;  %v1650_v27 = vpop.f32.mrb[15].mxu0 }
  0xf6   :  { %v252_v28 = vmax.f32 %v171_v26, 0.0 }
  0xf8   :  { %v273_v29 = vpack.c.bf16 %v252_v28, %v251_v25 }
  0xf9   :  { %v175_v30 = vpop.f32.mrb[16].mxu0 }
  0xfa   :  { %v176_v31 = vadd.f32 %v2156_v56, %v175_v30  ;;  %v1653_v32 = vpop.f32.mrb[17].mxu0  ;;  %1716 = vmatmul.mubr.bf16.gmra.mrb[12].mxu1 %v273_v29 }
  0xfb   :  { %v178_v33 = vpop.f32.mrb[18].mxu0  ;;  %1719 = vmatprep.mubr.msk.bf16.mxu1 %vm1938_vm0, %v1937_v0 }
  0xfc   :  { %v253_v34 = vmax.f32 %v176_v31, 0.0  ;;  %v179_v35 = vadd.f32 %v2156_v56, %v178_v33  ;;  %v1654_v36 = vpop.f32.mrb[19].mxu0 }
  0xfe   :  { %v254_v37 = vmax.f32 %v179_v35, 0.0 }
 0x100   :  { %v274_v38 = vpack.c.bf16 %v254_v37, %v253_v34 }
 0x101   :  { %v183_v39 = vpop.f32.mrb[20].mxu0 }
 0x102   :  { %1720 = vmatmul.mubr.bf16.gmra.mrb[16].mxu1 %v274_v38  ;;  %v184_v40 = vadd.f32 %v2156_v56, %v183_v39  ;;  %v1657_v41 = vpop.f32.mrb[21].mxu0 }
 0x103   :  { %v186_v42 = vpop.f32.mrb[22].mxu0  ;;  %1723 = vmatprep.mubr.msk.bf16.mxu1 %vm1938_vm0, %v1937_v0 }
 0x104   :  { %v255_v43 = vmax.f32 %v184_v40, 0.0  ;;  %v187_v44 = vadd.f32 %v2156_v56, %v186_v42  ;;  %v1658_v45 = vpop.f32.mrb[23].mxu0 }
 0x106   :  { %v256_v46 = vmax.f32 %v187_v44, 0.0 }
 0x108   :  { %v275_v47 = vpack.c.bf16 %v256_v46, %v255_v43 }
 0x109   :  { %v191_v48 = vpop.f32.mrb[24].mxu0 }
 0x10a   :  { %1724 = vmatmul.mubr.bf16.gmra.mrb[20].mxu1 %v275_v47  ;;  %v192_v49 = vadd.f32 %v2156_v56, %v191_v48  ;;  %v1661_v50 = vpop.f32.mrb[25].mxu0  ;;  %v1929_v47 = vld [vmem:[%s2634_s2 + $0x80] sm:$0xff]   ;;  %v1931_v48 = vld [vmem:[%s2634_s2 + $0x90] sm:$0xff]  }
 0x10b   :  { %v194_v51 = vpop.f32.mrb[26].mxu0  ;;  %1727 = vmatprep.mubr.msk.bf16.mxu1 %vm1938_vm0, %v1937_v0  ;;  %1899 = vmatpush3.bf16.msra.mxu1 %v1929_v47  ;;  %v1933_v50 = vld [vmem:[%s2634_s2 + $0xa0] sm:$0xff]  }
 0x10c   :  { %v257_v52 = vmax.f32 %v192_v49, 0.0  ;;  %v195_v53 = vadd.f32 %v2156_v56, %v194_v51  ;;  %v1662_v54 = vpop.f32.mrb[27].mxu0  ;;  %1892 = vmatprep.subr.bf16.mxu1 %v1937_v0  ;;  %v1932_v49 = vld [vmem:[%s2634_s2 + $0x98] sm:$0xff]   ;;  %v1934_v51 = vld [vmem:[%s2634_s2 + $0xa8] sm:$0xff]  }
 0x10e   :  { %v258_v55 = vmax.f32 %v195_v53, 0.0  ;;  %v2243_v53 = vld [vmem:[%s2635_s3 + $0x1] ss:$0 sm:$0xff] }
 0x110   :  { %v276_v57 = vpack.c.bf16 %v258_v55, %v257_v52  ;;  %v2236_v52 = vld [vmem:[%s2634_s2 + $0xb0] sm:$0xff]  }
 0x111   :  { %v199_v58 = vpop.f32.mrb[28].mxu0 }
 0x112   :  { %1728 = vmatmul.mubr.bf16.gmra.mrb[24].mxu1 %v276_v57  ;;  %v200_v59 = vadd.f32 %v2156_v56, %v199_v58  ;;  %v1665_v60 = vpop.f32.mrb[29].mxu0 }
 0x113   :  { %v202_v61 = vpop.f32.mrb[30].mxu0  ;;  %1731 = vmatprep.mubr.msk.bf16.mxu1 %vm1938_vm0, %v1937_v0 }
 0x114   :  { %v259_v62 = vmax.f32 %v200_v59, 0.0  ;;  %v203_v63 = vadd.f32 %v2156_v56, %v202_v61  ;;  %v1666_v1 = vpop.f32.mrb[31].mxu0 }
 0x116   :  { %v260_v2 = vmax.f32 %v203_v63, 0.0 }
 0x118   :  { %v277_v3 = vpack.c.bf16 %v260_v2, %v259_v62 }
 0x119   :  { %v207_v4 = vpop.f32.mrb[32].mxu0 }
 0x11a   :  { %v208_v5 = vadd.f32 %v2156_v56, %v207_v4  ;;  %v1669_v6 = vpop.f32.mrb[33].mxu0  ;;  %1732 = vmatmul.mubr.bf16.gmra.mrb[28].mxu1 %v277_v3 }
 0x11b   :  { %v210_v7 = vpop.f32.mrb[34].mxu0  ;;  %1735 = vmatprep.mubr.msk.bf16.mxu1 %vm1938_vm0, %v1937_v0 }
 0x11c   :  { %v261_v8 = vmax.f32 %v208_v5, 0.0  ;;  %v211_v9 = vadd.f32 %v2156_v56, %v210_v7  ;;  %v1670_v10 = vpop.f32.mrb[35].mxu0 }
 0x11e   :  { %v262_v11 = vmax.f32 %v211_v9, 0.0 }
 0x120   :  { %v278_v12 = vpack.c.bf16 %v262_v11, %v261_v8 }
 0x121   :  { %v215_v13 = vpop.f32.mrb[36].mxu0 }
 0x122   :  { %v216_v14 = vadd.f32 %v2156_v56, %v215_v13  ;;  %v1673_v15 = vpop.f32.mrb[37].mxu0  ;;  %1736 = vmatmul.mubr.bf16.gmra.mrb[32].mxu1 %v278_v12 }
 0x123   :  { %v218_v16 = vpop.f32.mrb[38].mxu0  ;;  %1739 = vmatprep.mubr.msk.bf16.mxu1 %vm1938_vm0, %v1937_v0 }
 0x124   :  { %v263_v17 = vmax.f32 %v216_v14, 0.0  ;;  %v219_v18 = vadd.f32 %v2156_v56, %v218_v16  ;;  %v1674_v19 = vpop.f32.mrb[39].mxu0 }
 0x126   :  { %v264_v20 = vmax.f32 %v219_v18, 0.0 }
 0x128   :  { %v279_v21 = vpack.c.bf16 %v264_v20, %v263_v17 }
 0x129   :  { %v223_v22 = vpop.f32.mrb[40].mxu0 }
 0x12a   :  { %v224_v23 = vadd.f32 %v2156_v56, %v223_v22  ;;  %v1677_v24 = vpop.f32.mrb[41].mxu0  ;;  %1740 = vmatmul.mubr.bf16.gmra.mrb[36].mxu1 %v279_v21 }
 0x12b   :  { %v226_v25 = vpop.f32.mrb[42].mxu0  ;;  %1743 = vmatprep.mubr.msk.bf16.mxu1 %vm1938_vm0, %v1937_v0 }
 0x12c   :  { %v265_v26 = vmax.f32 %v224_v23, 0.0  ;;  %v227_v27 = vadd.f32 %v2156_v56, %v226_v25  ;;  %v1678_v28 = vpop.f32.mrb[43].mxu0 }
 0x12e   :  { %v266_v29 = vmax.f32 %v227_v27, 0.0 }
 0x130   :  { %v280_v30 = vpack.c.bf16 %v266_v29, %v265_v26 }
 0x131   :  { %v231_v31 = vpop.f32.mrb[44].mxu0 }
 0x132   :  { %v232_v32 = vadd.f32 %v2156_v56, %v231_v31  ;;  %v1681_v33 = vpop.f32.mrb[45].mxu0  ;;  %1744 = vmatmul.mubr.bf16.gmra.mrb[40].mxu1 %v280_v30 }
 0x133   :  { %v234_v34 = vpop.f32.mrb[46].mxu0  ;;  %1747 = vmatprep.mubr.msk.bf16.mxu1 %vm1938_vm0, %v1937_v0 }
 0x134   :  { %v267_v35 = vmax.f32 %v232_v32, 0.0  ;;  %v235_v36 = vadd.f32 %v2156_v56, %v234_v34  ;;  %v1682_v37 = vpop.f32.mrb[47].mxu0 }
 0x136   :  { %v268_v38 = vmax.f32 %v235_v36, 0.0 }
 0x138   :  { %v281_v39 = vpack.c.bf16 %v268_v38, %v267_v35 }
 0x139   :  { %v239_v40 = vpop.f32.mrb[48].mxu0 }
 0x13a   :  { %1748 = vmatmul.mubr.bf16.gmra.mrb[44].mxu1 %v281_v39  ;;  %v240_v41 = vadd.f32 %v2156_v56, %v239_v40  ;;  %v1685_v42 = vpop.f32.mrb[49].mxu0  ;;  %v1930_v56 = vld [vmem:[%s2634_s2 + $0x88] sm:$0xff]  }
 0x13b   :  { %v242_v43 = vpop.f32.mrb[50].mxu0  ;;  %1751 = vmatprep.mubr.msk.bf16.mxu1 %vm1938_vm0, %v1937_v0  ;;  %1900 = vmatpush3.bf16.msra.mxu1 %v1930_v56 }
 0x13c   :  { %v269_v44 = vmax.f32 %v240_v41, 0.0  ;;  %v1686_v45 = vpop.f32.mrb[51].mxu0  ;;  %1893 = vmatprep.subr.bf16.mxu1 %v1937_v0 }
 0x13e   :  { %v282_v46 = vpack.c.bf16 %v269_v44, %v269_v44 }
 0x13f   :  { %1901 = vmatpush3.bf16.msra.mxu1 %v1931_v48 }
 0x140   :  { %1894 = vmatprep.subr.bf16.mxu1 %v1937_v0 }
 0x142   :  { %1752 = vmatmul.mubr.bf16.gmra.mrb[48].mxu1 %v282_v46 }
 0x143   :  { %1843 = vmatprep.mubr.msk.bf16.mxu1 %vm1938_vm0, %v1937_v0  ;;  %1902 = vmatpush3.bf16.msra.mxu1 %v1932_v49 }
 0x144   :  { %1895 = vmatprep.subr.bf16.mxu1 %v1937_v0 }
 0x147   :  { %1903 = vmatpush3.bf16.msra.mxu1 %v1933_v50 }
 0x148   :  { %1896 = vmatprep.subr.bf16.mxu1 %v1937_v0 }
 0x14b   :  { %1904 = vmatpush3.bf16.msra.mxu1 %v1934_v51 }
 0x14c   :  { %1897 = vmatprep.subr.bf16.mxu1 %v1937_v0 }
 0x14f   :  { %1905 = vmatpush3.bf16.msra.mxu1 %v2236_v52 }
 0x150   :  { %1898 = vmatprep.subr.bf16.mxu1 %v1937_v0 }
 0x1b5   :  { %v386_v54 = vpop.f32.mrb[0].mxu1 }
 0x1b6   :  { %v387_v55 = vadd.f32 %v2243_v53, %v386_v54  ;;  %v1705_v57 = vpop.f32.mrb[1].mxu1 }
 0x1b7   :  { %v389_v58 = vpop.f32.mrb[2].mxu1 }
 0x1b8   :  { %v390_v59 = vadd.f32 %v2243_v53, %v389_v58  ;;  %v1706_v60 = vpop.f32.mrb[3].mxu1  ;;  %v488_v61 = vmax.f32 %v387_v55, 0.0 }
 0x1ba   :  { %v489_v62 = vmax.f32 %v390_v59, 0.0 }
 0x1bc   :  { %v513_v63 = vpack.c.bf16 %v489_v62, %v488_v61 }
 0x1bd   :  { %v394_v1 = vpop.f32.mrb[4].mxu1 }
 0x1be   :  { %v395_v2 = vadd.f32 %v2243_v53, %v394_v1  ;;  %v1709_v3 = vpop.f32.mrb[5].mxu1  ;;  %1772 = vmatmul.mubr.bf16.vlgmr.msra.gmra.mrb[52].mxu0 %v513_v63 }
 0x1bf   :  { %v397_v4 = vpop.f32.mrb[6].mxu1  ;;  %1775 = vmatprep.mubr.msk.bf16.mxu0 %vm1938_vm0, %v1937_v0  ;;  %1824 = vmatpush3.bf16.msra.mxu0 %v1929_v47 }
 0x1c0   :  { %v398_v5 = vadd.f32 %v2243_v53, %v397_v4  ;;  %v1710_v6 = vpop.f32.mrb[7].mxu1  ;;  %1825 = vmatprep.subr.bf16.mxu0 %v1937_v0  ;;  %v490_v7 = vmax.f32 %v395_v2, 0.0 }
 0x1c2   :  { %v491_v8 = vmax.f32 %v398_v5, 0.0 }
 0x1c3   :  { %1826 = vmatpush3.bf16.msra.mxu0 %v1930_v56 }
 0x1c4   :  { %v514_v9 = vpack.c.bf16 %v491_v8, %v490_v7  ;;  %1827 = vmatprep.subr.bf16.mxu0 %v1937_v0 }
 0x1c5   :  { %v402_v10 = vpop.f32.mrb[8].mxu1 }
 0x1c6   :  { %1776 = vmatmul.mubr.bf16.gmra.mrb[56].mxu0 %v514_v9  ;;  %v403_v11 = vadd.f32 %v2243_v53, %v402_v10  ;;  %v1713_v12 = vpop.f32.mrb[9].mxu1 }
 0x1c7   :  { %v405_v13 = vpop.f32.mrb[10].mxu1  ;;  %1779 = vmatprep.mubr.msk.bf16.mxu0 %vm1938_vm0, %v1937_v0  ;;  %1828 = vmatpush3.bf16.msra.mxu0 %v1931_v48 }
 0x1c8   :  { %v492_v14 = vmax.f32 %v403_v11, 0.0  ;;  %v406_v15 = vadd.f32 %v2243_v53, %v405_v13  ;;  %v1714_v16 = vpop.f32.mrb[11].mxu1  ;;  %1829 = vmatprep.subr.bf16.mxu0 %v1937_v0 }
 0x1ca   :  { %v493_v17 = vmax.f32 %v406_v15, 0.0 }
 0x1cb   :  { %1830 = vmatpush3.bf16.msra.mxu0 %v1932_v49 }
 0x1cc   :  { %v515_v18 = vpack.c.bf16 %v493_v17, %v492_v14  ;;  %1831 = vmatprep.subr.bf16.mxu0 %v1937_v0 }
 0x1cd   :  { %v410_v19 = vpop.f32.mrb[12].mxu1 }
 0x1ce   :  { %v411_v20 = vadd.f32 %v2243_v53, %v410_v19  ;;  %v1717_v21 = vpop.f32.mrb[13].mxu1  ;;  %1780 = vmatmul.mubr.bf16.gmra.mrb[60].mxu0 %v515_v18 }
 0x1cf   :  { %v413_v22 = vpop.f32.mrb[14].mxu1  ;;  %1783 = vmatprep.mubr.msk.bf16.mxu0 %vm1938_vm0, %v1937_v0  ;;  %1832 = vmatpush3.bf16.msra.mxu0 %v1933_v50 }
 0x1d0   :  { %v494_v23 = vmax.f32 %v411_v20, 0.0  ;;  %v414_v24 = vadd.f32 %v2243_v53, %v413_v22  ;;  %v1718_v25 = vpop.f32.mrb[15].mxu1  ;;  %1833 = vmatprep.subr.bf16.mxu0 %v1937_v0 }
 0x1d2   :  { %v495_v26 = vmax.f32 %v414_v24, 0.0 }
 0x1d3   :  { %1834 = vmatpush3.bf16.msra.mxu0 %v1934_v51 }
 0x1d4   :  { %v516_v27 = vpack.c.bf16 %v495_v26, %v494_v23  ;;  %1835 = vmatprep.subr.bf16.mxu0 %v1937_v0 }
 0x1d5   :  { %v418_v28 = vpop.f32.mrb[16].mxu1 }
 0x1d6   :  { %v419_v29 = vadd.f32 %v2243_v53, %v418_v28  ;;  %v1721_v30 = vpop.f32.mrb[17].mxu1  ;;  %1784 = vmatmul.mubr.bf16.gmra.mrb[64].mxu0 %v516_v27 }
 0x1d7   :  { %v421_v31 = vpop.f32.mrb[18].mxu1  ;;  %1787 = vmatprep.mubr.msk.bf16.mxu0 %vm1938_vm0, %v1937_v0  ;;  %1836 = vmatpush3.bf16.msra.mxu0 %v2236_v52 }
 0x1d8   :  { %v496_v32 = vmax.f32 %v419_v29, 0.0  ;;  %v422_v33 = vadd.f32 %v2243_v53, %v421_v31  ;;  %v1722_v34 = vpop.f32.mrb[19].mxu1  ;;  %1837 = vmatprep.subr.bf16.mxu0 %v1937_v0 }
 0x1da   :  { %v497_v35 = vmax.f32 %v422_v33, 0.0 }
 0x1dc   :  { %v517_v36 = vpack.c.bf16 %v497_v35, %v496_v32 }
 0x1dd   :  { %v426_v37 = vpop.f32.mrb[20].mxu1 }
 0x1de   :  { %1788 = vmatmul.mubr.bf16.gmra.mrb[68].mxu0 %v517_v36  ;;  %v427_v38 = vadd.f32 %v2243_v53, %v426_v37  ;;  %v1725_v39 = vpop.f32.mrb[21].mxu1 }
 0x1df   :  { %v429_v40 = vpop.f32.mrb[22].mxu1  ;;  %1791 = vmatprep.mubr.msk.bf16.mxu0 %vm1938_vm0, %v1937_v0 }
 0x1e0   :  { %v498_v41 = vmax.f32 %v427_v38, 0.0  ;;  %v430_v42 = vadd.f32 %v2243_v53, %v429_v40  ;;  %v1726_v43 = vpop.f32.mrb[23].mxu1  ;;  %v1936_v38 = vld [vmem:[%s2634_s2 + $0xb8] sm:$0xff]  }
 0x1e1   :  { %1906 = vmatpush3.bf16.msra.mxu1 %v1936_v38  ;;  %1838 = vmatpush3.bf16.msra.mxu0 %v1936_v38 }
 0x1e2   :  { %v499_v44 = vmax.f32 %v430_v42, 0.0 }
 0x1e4   :  { %v518_v45 = vpack.c.bf16 %v499_v44, %v498_v41 }
 0x1e5   :  { %v434_v46 = vpop.f32.mrb[24].mxu1 }
 0x1e6   :  { %1792 = vmatmul.mubr.bf16.gmra.mrb[72].mxu0 %v518_v45  ;;  %v435_v47 = vadd.f32 %v2243_v53, %v434_v46  ;;  %v1729_v56 = vpop.f32.mrb[25].mxu1  ;;  %v2310_v46 = vld [vmem:[%s2635_s3 + $0x2] ss:$0 sm:$0xff] }
 0x1e7   :  { %v437_v48 = vpop.f32.mrb[26].mxu1  ;;  %1795 = vmatprep.mubr.msk.bf16.mxu0 %vm1938_vm0, %v1937_v0 }
 0x1e8   :  { %v500_v49 = vmax.f32 %v435_v47, 0.0  ;;  %v438_v50 = vadd.f32 %v2243_v53, %v437_v48  ;;  %v1730_v51 = vpop.f32.mrb[27].mxu1 }
 0x1ea   :  { %v501_v52 = vmax.f32 %v438_v50, 0.0 }
 0x1ec   :  { %v519_v54 = vpack.c.bf16 %v501_v52, %v500_v49 }
 0x1ed   :  { %v442_v55 = vpop.f32.mrb[28].mxu1 }
 0x1ee   :  { %1796 = vmatmul.mubr.bf16.gmra.mrb[76].mxu0 %v519_v54  ;;  %v443_v57 = vadd.f32 %v2243_v53, %v442_v55  ;;  %v1733_v58 = vpop.f32.mrb[29].mxu1 }
 0x1ef   :  { %v445_v59 = vpop.f32.mrb[30].mxu1  ;;  %1799 = vmatprep.mubr.msk.bf16.mxu0 %vm1938_vm0, %v1937_v0 }
 0x1f0   :  { %v502_v60 = vmax.f32 %v443_v57, 0.0  ;;  %v446_v61 = vadd.f32 %v2243_v53, %v445_v59  ;;  %v1734_v62 = vpop.f32.mrb[31].mxu1 }
 0x1f2   :  { %v503_v63 = vmax.f32 %v446_v61, 0.0 }
 0x1f4   :  { %v520_v1 = vpack.c.bf16 %v503_v63, %v502_v60 }
 0x1f5   :  { %v450_v2 = vpop.f32.mrb[32].mxu1 }
 0x1f6   :  { %v451_v3 = vadd.f32 %v2243_v53, %v450_v2  ;;  %v1737_v4 = vpop.f32.mrb[33].mxu1  ;;  %1800 = vmatmul.mubr.bf16.gmra.mrb[80].mxu0 %v520_v1 }
 0x1f7   :  { %v453_v5 = vpop.f32.mrb[34].mxu1  ;;  %1803 = vmatprep.mubr.msk.bf16.mxu0 %vm1938_vm0, %v1937_v0 }
 0x1f8   :  { %v504_v6 = vmax.f32 %v451_v3, 0.0  ;;  %v454_v7 = vadd.f32 %v2243_v53, %v453_v5  ;;  %v1738_v8 = vpop.f32.mrb[35].mxu1 }
 0x1fa   :  { %v505_v9 = vmax.f32 %v454_v7, 0.0 }
 0x1fc   :  { %v521_v10 = vpack.c.bf16 %v505_v9, %v504_v6 }
 0x1fd   :  { %v458_v11 = vpop.f32.mrb[36].mxu1 }
 0x1fe   :  { %v459_v12 = vadd.f32 %v2243_v53, %v458_v11  ;;  %v1741_v13 = vpop.f32.mrb[37].mxu1  ;;  %1804 = vmatmul.mubr.bf16.gmra.mrb[84].mxu0 %v521_v10 }
 0x1ff   :  { %v461_v14 = vpop.f32.mrb[38].mxu1  ;;  %1807 = vmatprep.mubr.msk.bf16.mxu0 %vm1938_vm0, %v1937_v0 }
 0x200   :  { %v506_v15 = vmax.f32 %v459_v12, 0.0  ;;  %v462_v16 = vadd.f32 %v2243_v53, %v461_v14  ;;  %v1742_v17 = vpop.f32.mrb[39].mxu1 }
 0x202   :  { %v507_v18 = vmax.f32 %v462_v16, 0.0 }
 0x204   :  { %v522_v19 = vpack.c.bf16 %v507_v18, %v506_v15 }
 0x205   :  { %v466_v20 = vpop.f32.mrb[40].mxu1 }
 0x206   :  { %v467_v21 = vadd.f32 %v2243_v53, %v466_v20  ;;  %v1745_v22 = vpop.f32.mrb[41].mxu1  ;;  %1808 = vmatmul.mubr.bf16.gmra.mrb[88].mxu0 %v522_v19 }
 0x207   :  { %v469_v23 = vpop.f32.mrb[42].mxu1  ;;  %1811 = vmatprep.mubr.msk.bf16.mxu0 %vm1938_vm0, %v1937_v0 }
 0x208   :  { %v508_v24 = vmax.f32 %v467_v21, 0.0  ;;  %v470_v25 = vadd.f32 %v2243_v53, %v469_v23  ;;  %v1746_v26 = vpop.f32.mrb[43].mxu1 }
 0x20a   :  { %v509_v27 = vmax.f32 %v470_v25, 0.0 }
 0x20c   :  { %v523_v28 = vpack.c.bf16 %v509_v27, %v508_v24 }
 0x20d   :  { %v474_v29 = vpop.f32.mrb[44].mxu1 }
 0x20e   :  { %v475_v30 = vadd.f32 %v2243_v53, %v474_v29  ;;  %v1749_v31 = vpop.f32.mrb[45].mxu1  ;;  %1812 = vmatmul.mubr.bf16.gmra.mrb[92].mxu0 %v523_v28 }
 0x20f   :  { %v477_v32 = vpop.f32.mrb[46].mxu1  ;;  %1815 = vmatprep.mubr.msk.bf16.mxu0 %vm1938_vm0, %v1937_v0 }
 0x210   :  { %v510_v33 = vmax.f32 %v475_v30, 0.0  ;;  %v478_v34 = vadd.f32 %v2243_v53, %v477_v32  ;;  %v1750_v35 = vpop.f32.mrb[47].mxu1 }
 0x212   :  { %v511_v36 = vmax.f32 %v478_v34, 0.0 }
 0x214   :  { %v524_v37 = vpack.c.bf16 %v511_v36, %v510_v33 }
 0x215   :  { %v482_v39 = vpop.f32.mrb[48].mxu1 }
 0x216   :  { %1816 = vmatmul.mubr.bf16.gmra.mrb[96].mxu0 %v524_v37  ;;  %v483_v40 = vadd.f32 %v2243_v53, %v482_v39  ;;  %v1753_v41 = vpop.f32.mrb[49].mxu1 }
 0x217   :  { %v485_v42 = vpop.f32.mrb[50].mxu1  ;;  %1819 = vmatprep.mubr.msk.bf16.mxu0 %vm1938_vm0, %v1937_v0 }
 0x218   :  { %v512_v43 = vmax.f32 %v483_v40, 0.0  ;;  %v1754_v44 = vpop.f32.mrb[51].mxu1 }
 0x21a   :  { %v525_v45 = vpack.c.bf16 %v512_v43, %v512_v43 }
 0x21e   :  { %1820 = vmatmul.mubr.bf16.gmra.mrb[100].mxu0 %v525_v45 }
 0x21f   :  { %1839 = vmatprep.mubr.msk.bf16.mxu0 %vm1938_vm0, %v1937_v0 }
 0x291   :  { %v630_v53 = vpop.f32.mrb[52].mxu0 }
 0x292   :  { %v631_v47 = vadd.f32 %v2310_v46, %v630_v53  ;;  %v1773_v56 = vpop.f32.mrb[53].mxu0 }
 0x293   :  { %v633_v48 = vpop.f32.mrb[54].mxu0 }
 0x294   :  { %v634_v49 = vadd.f32 %v2310_v46, %v633_v48  ;;  %v1774_v50 = vpop.f32.mrb[55].mxu0  ;;  %v732_v51 = vmax.f32 %v631_v47, 0.0 }
 0x296   :  { %v733_v52 = vmax.f32 %v634_v49, 0.0 }
 0x298   :  { %v757_v54 = vpack.c.bf16 %v733_v52, %v732_v51 }
 0x299   :  { %v638_v55 = vpop.f32.mrb[56].mxu0 }
 0x29a   :  { %v639_v57 = vadd.f32 %v2310_v46, %v638_v55  ;;  %v1777_v58 = vpop.f32.mrb[57].mxu0  ;;  %1840 = vmatmul.mubr.bf16.vlgmr.msra.gmra.mrb[104].mxu0 %v757_v54 }
 0x29b   :  { %v641_v59 = vpop.f32.mrb[58].mxu0 }
 0x29c   :  { %v642_v60 = vadd.f32 %v2310_v46, %v641_v59  ;;  %v1778_v61 = vpop.f32.mrb[59].mxu0  ;;  %v734_v62 = vmax.f32 %v639_v57, 0.0 }
 0x29e   :  { %v735_v63 = vmax.f32 %v642_v60, 0.0 }
 0x2a0   :  { %v758_v1 = vpack.c.bf16 %v735_v63, %v734_v62 }
 0x2a1   :  { %v646_v2 = vpop.f32.mrb[60].mxu0 }
 0x2a2   :  { %1844 = vmatmul.mubr.bf16.vlgmr.msra.gmra.mrb[52].mxu1 %v758_v1  ;;  %v647_v3 = vadd.f32 %v2310_v46, %v646_v2  ;;  %v1781_v4 = vpop.f32.mrb[61].mxu0 }
 0x2a3   :  { %v649_v5 = vpop.f32.mrb[62].mxu0  ;;  %1847 = vmatprep.mubr.msk.bf16.mxu1 %vm1938_vm0, %v1937_v0 }
 0x2a4   :  { %v736_v6 = vmax.f32 %v647_v3, 0.0  ;;  %v650_v7 = vadd.f32 %v2310_v46, %v649_v5  ;;  %v1782_v8 = vpop.f32.mrb[63].mxu0 }
 0x2a6   :  { %v737_v9 = vmax.f32 %v650_v7, 0.0 }
 0x2a8   :  { %v759_v10 = vpack.c.bf16 %v737_v9, %v736_v6 }
 0x2a9   :  { %v654_v11 = vpop.f32.mrb[64].mxu0 }
 0x2aa   :  { %v655_v12 = vadd.f32 %v2310_v46, %v654_v11  ;;  %v1785_v13 = vpop.f32.mrb[65].mxu0  ;;  %1848 = vmatmul.mubr.bf16.gmra.mrb[56].mxu1 %v759_v10 }
 0x2ab   :  { %v657_v14 = vpop.f32.mrb[66].mxu0  ;;  %1851 = vmatprep.mubr.msk.bf16.mxu1 %vm1938_vm0, %v1937_v0 }
 0x2ac   :  { %v738_v15 = vmax.f32 %v655_v12, 0.0  ;;  %v658_v16 = vadd.f32 %v2310_v46, %v657_v14  ;;  %v1786_v17 = vpop.f32.mrb[67].mxu0 }
 0x2ae   :  { %v739_v18 = vmax.f32 %v658_v16, 0.0 }
 0x2b0   :  { %v760_v19 = vpack.c.bf16 %v739_v18, %v738_v15 }
 0x2b1   :  { %v662_v20 = vpop.f32.mrb[68].mxu0 }
 0x2b2   :  { %v663_v21 = vadd.f32 %v2310_v46, %v662_v20  ;;  %v1789_v22 = vpop.f32.mrb[69].mxu0  ;;  %1852 = vmatmul.mubr.bf16.gmra.mrb[60].mxu1 %v760_v19 }
 0x2b3   :  { %v665_v23 = vpop.f32.mrb[70].mxu0  ;;  %1855 = vmatprep.mubr.msk.bf16.mxu1 %vm1938_vm0, %v1937_v0 }
 0x2b4   :  { %v740_v24 = vmax.f32 %v663_v21, 0.0  ;;  %v666_v25 = vadd.f32 %v2310_v46, %v665_v23  ;;  %v1790_v26 = vpop.f32.mrb[71].mxu0 }
 0x2b6   :  { %v741_v27 = vmax.f32 %v666_v25, 0.0 }
 0x2b8   :  { %v761_v28 = vpack.c.bf16 %v741_v27, %v740_v24 }
 0x2b9   :  { %v670_v29 = vpop.f32.mrb[72].mxu0 }
 0x2ba   :  { %1856 = vmatmul.mubr.bf16.gmra.mrb[64].mxu1 %v761_v28  ;;  %v671_v30 = vadd.f32 %v2310_v46, %v670_v29  ;;  %v1793_v31 = vpop.f32.mrb[73].mxu0  ;;  %v1939_v29 = vmov 0  }
 0x2bb   :  { %v673_v32 = vpop.f32.mrb[74].mxu0  ;;  %1859 = vmatprep.mubr.msk.bf16.mxu1 %vm1938_vm0, %v1937_v0  ;;  %1910 = vset.pattern.permute.xlu1 %v1939_v29 }
 0x2bc   :  { %v742_v33 = vmax.f32 %v671_v30, 0.0  ;;  %v674_v34 = vadd.f32 %v2310_v46, %v673_v32  ;;  %v1794_v35 = vpop.f32.mrb[75].mxu0  ;;  %1911 = vset.pattern.permute.xlu0 %v1939_v29 }
 0x2be   :  { %v743_v36 = vmax.f32 %v674_v34, 0.0 }
 0x2c0   :  { %v762_v37 = vpack.c.bf16 %v743_v36, %v742_v33 }
 0x2c1   :  { %v678_v38 = vpop.f32.mrb[76].mxu0 }
 0x2c2   :  { %1860 = vmatmul.mubr.bf16.gmra.mrb[68].mxu1 %v762_v37  ;;  %v679_v39 = vadd.f32 %v2310_v46, %v678_v38  ;;  %v1797_v40 = vpop.f32.mrb[77].mxu0  ;;  %v976_v38 = vlaneseq }
 0x2c3   :  { %v681_v41 = vpop.f32.mrb[78].mxu0  ;;  %1863 = vmatprep.mubr.msk.bf16.mxu1 %vm1938_vm0, %v1937_v0  ;;  %v2362_v40 = vld [vmem:[%s2635_s3 + $0x3] ss:$0 sm:$0xff] }
 0x2c4   :  { %v744_v42 = vmax.f32 %v679_v39, 0.0  ;;  %v682_v43 = vadd.f32 %v2310_v46, %v681_v41  ;;  %v1798_v44 = vpop.f32.mrb[79].mxu0  ;;  %v977_v39 = vand.u32 127, %v976_v38 }
 0x2c6   :  { %v745_v45 = vmax.f32 %v682_v43, 0.0  ;;  %vm978_vm2 = vcmp.ge.s32.totalorder %v977_v39, 1  ;;  %vm979_vm3 = vcmp.le.s32.totalorder %v977_v39, 4 }
 0x2c7   :  { %vm2364_vm4 = vmand %vm978_vm2, %vm979_vm3 }
 0x2c8   :  { %v763_v53 = vpack.c.bf16 %v745_v45, %v744_v42 }
 0x2c9   :  { %v686_v47 = vpop.f32.mrb[80].mxu0 }
 0x2ca   :  { %1864 = vmatmul.mubr.bf16.gmra.mrb[72].mxu1 %v763_v53  ;;  %v687_v56 = vadd.f32 %v2310_v46, %v686_v47  ;;  %v1801_v48 = vpop.f32.mrb[81].mxu0 }
 0x2cb   :  { %v689_v49 = vpop.f32.mrb[82].mxu0  ;;  %1867 = vmatprep.mubr.msk.bf16.mxu1 %vm1938_vm0, %v1937_v0 }
 0x2cc   :  { %v746_v50 = vmax.f32 %v687_v56, 0.0  ;;  %v690_v51 = vadd.f32 %v2310_v46, %v689_v49  ;;  %v1802_v52 = vpop.f32.mrb[83].mxu0 }
 0x2ce   :  { %v747_v54 = vmax.f32 %v690_v51, 0.0 }
 0x2d0   :  { %v764_v55 = vpack.c.bf16 %v747_v54, %v746_v50 }
 0x2d1   :  { %v694_v57 = vpop.f32.mrb[84].mxu0 }
 0x2d2   :  { %v695_v58 = vadd.f32 %v2310_v46, %v694_v57  ;;  %v1805_v59 = vpop.f32.mrb[85].mxu0  ;;  %1868 = vmatmul.mubr.bf16.gmra.mrb[76].mxu1 %v764_v55 }
 0x2d3   :  { %v697_v60 = vpop.f32.mrb[86].mxu0  ;;  %1871 = vmatprep.mubr.msk.bf16.mxu1 %vm1938_vm0, %v1937_v0 }
 0x2d4   :  { %v748_v61 = vmax.f32 %v695_v58, 0.0  ;;  %v698_v62 = vadd.f32 %v2310_v46, %v697_v60  ;;  %v1806_v63 = vpop.f32.mrb[87].mxu0 }
 0x2d6   :  { %v749_v1 = vmax.f32 %v698_v62, 0.0 }
 0x2d8   :  { %v765_v2 = vpack.c.bf16 %v749_v1, %v748_v61 }
 0x2d9   :  { %v702_v3 = vpop.f32.mrb[88].mxu0 }
 0x2da   :  { %v703_v4 = vadd.f32 %v2310_v46, %v702_v3  ;;  %v1809_v5 = vpop.f32.mrb[89].mxu0  ;;  %1872 = vmatmul.mubr.bf16.gmra.mrb[80].mxu1 %v765_v2 }
 0x2db   :  { %v705_v6 = vpop.f32.mrb[90].mxu0  ;;  %1875 = vmatprep.mubr.msk.bf16.mxu1 %vm1938_vm0, %v1937_v0 }
 0x2dc   :  { %v750_v7 = vmax.f32 %v703_v4, 0.0  ;;  %v706_v8 = vadd.f32 %v2310_v46, %v705_v6  ;;  %v1810_v9 = vpop.f32.mrb[91].mxu0 }
 0x2de   :  { %v751_v10 = vmax.f32 %v706_v8, 0.0 }
 0x2e0   :  { %v766_v11 = vpack.c.bf16 %v751_v10, %v750_v7 }
 0x2e1   :  { %v710_v12 = vpop.f32.mrb[92].mxu0 }
 0x2e2   :  { %v711_v13 = vadd.f32 %v2310_v46, %v710_v12  ;;  %v1813_v14 = vpop.f32.mrb[93].mxu0  ;;  %1876 = vmatmul.mubr.bf16.gmra.mrb[84].mxu1 %v766_v11 }
 0x2e3   :  { %v713_v15 = vpop.f32.mrb[94].mxu0  ;;  %1879 = vmatprep.mubr.msk.bf16.mxu1 %vm1938_vm0, %v1937_v0 }
 0x2e4   :  { %v752_v16 = vmax.f32 %v711_v13, 0.0  ;;  %v714_v17 = vadd.f32 %v2310_v46, %v713_v15  ;;  %v1814_v18 = vpop.f32.mrb[95].mxu0 }
 0x2e6   :  { %v753_v19 = vmax.f32 %v714_v17, 0.0 }
 0x2e8   :  { %v767_v20 = vpack.c.bf16 %v753_v19, %v752_v16 }
 0x2e9   :  { %v718_v21 = vpop.f32.mrb[96].mxu0 }
 0x2ea   :  { %v719_v22 = vadd.f32 %v2310_v46, %v718_v21  ;;  %v1817_v23 = vpop.f32.mrb[97].mxu0  ;;  %1880 = vmatmul.mubr.bf16.gmra.mrb[88].mxu1 %v767_v20 }
 0x2eb   :  { %v721_v24 = vpop.f32.mrb[98].mxu0  ;;  %1883 = vmatprep.mubr.msk.bf16.mxu1 %vm1938_vm0, %v1937_v0 }
 0x2ec   :  { %v754_v25 = vmax.f32 %v719_v22, 0.0  ;;  %v722_v26 = vadd.f32 %v2310_v46, %v721_v24  ;;  %v1818_v27 = vpop.f32.mrb[99].mxu0 }
 0x2ee   :  { %v755_v28 = vmax.f32 %v722_v26, 0.0 }
 0x2f0   :  { %v768_v30 = vpack.c.bf16 %v755_v28, %v754_v25 }
 0x2f1   :  { %v726_v31 = vpop.f32.mrb[100].mxu0 }
 0x2f2   :  { %1884 = vmatmul.mubr.bf16.gmra.mrb[92].mxu1 %v768_v30  ;;  %v727_v32 = vadd.f32 %v2310_v46, %v726_v31  ;;  %v1821_v33 = vpop.f32.mrb[101].mxu0 }
 0x2f3   :  { %v729_v34 = vpop.f32.mrb[102].mxu0  ;;  %1887 = vmatprep.mubr.msk.bf16.mxu1 %vm1938_vm0, %v1937_v0 }
 0x2f4   :  { %v756_v35 = vmax.f32 %v727_v32, 0.0  ;;  %v1822_v36 = vpop.f32.mrb[103].mxu0 }
 0x2f6   :  { %v769_v37 = vpack.c.bf16 %v756_v35, %v756_v35 }
 0x2fa   :  { %1888 = vmatmul.mubr.bf16.gmra.mrb[96].mxu1 %v769_v37 }
 0x36d   :  { %v874_v41 = vpop.f32.mrb[104].mxu0 }
 0x36e   :  { %v2369_v0 = vadd.f32 %v2362_v40, %v874_v41  ;;  %v1841_v42 = vpop.f32.mrb[105].mxu0 }
 0x36f   :  { %v877_v43 = vpop.f32.mrb[106].mxu0 }
 0x370   :  { %1083 = vperm.xlu1 %1910, %v2369_v0   ;;  %v1842_v44 = vpop.f32.mrb[107].mxu0  ;;  %v981_v45 = vsel %vm2364_vm4, %v2369_v0, -1e+30  ;;  %v2382_v55 = vadd.f32 %v2362_v40, %v877_v43 }
 0x371   :  { %1006 = vmax.xlane.f32.xlu0 %v981_v45 }
 0x372   :  { %v982_v12 = vsel %vm2364_vm4, %v2382_v55, -1e+30 }
 0x375   :  { %v882_v53 = vpop.f32.mrb[52].mxu1 }
 0x376   :  { %v2376_v47 = vadd.f32 %v2362_v40, %v882_v53  ;;  %v1845_v56 = vpop.f32.mrb[53].mxu1 }
 0x377   :  { %v885_v48 = vpop.f32.mrb[54].mxu1 }
 0x378   :  { %v1846_v49 = vpop.f32.mrb[55].mxu1  ;;  %1093 = vperm.xlu1 %1910, %v2376_v47   ;;  %v983_v6 = vsel %vm2364_vm4, %v2376_v47, -1e+30  ;;  %v2411_v19 = vadd.f32 %v2362_v40, %v885_v48 }
 0x37a   :  { %v984_v44 = vsel %vm2364_vm4, %v2411_v19, -1e+30 }
 0x37d   :  { %v890_v50 = vpop.f32.mrb[56].mxu1 }
 0x37e   :  { %v1849_v51 = vpop.f32.mrb[57].mxu1  ;;  %v2397_v11 = vadd.f32 %v2362_v40, %v890_v50 }
 0x37f   :  { %v2379_v52 = vpop.f32.mrb[58].mxu1 }
 0x380   :  { %v1850_v54 = vpop.f32.mrb[59].mxu1  ;;  %v985_v16 = vsel %vm2364_vm4, %v2397_v11, -1e+30  ;;  %v894_v53 = vadd.f32 %v2362_v40, %v2379_v52 }
 0x382   :  { %v986_v49 = vsel %vm2364_vm4, %v894_v53, -1e+30 }
 0x385   :  { %v898_v57 = vpop.f32.mrb[60].mxu1 }
 0x386   :  { %v1853_v58 = vpop.f32.mrb[61].mxu1  ;;  %v2403_v15 = vadd.f32 %v2362_v40, %v898_v57 }
 0x387   :  { %1088 = vperm.xlu0 %1911, %v2382_v55   ;;  %v2385_v59 = vpop.f32.mrb[62].mxu1 }
 0x388   :  { %v1854_v60 = vpop.f32.mrb[63].mxu1  ;;  %v987_v21 = vsel %vm2364_vm4, %v2403_v15, -1e+30  ;;  %v2466_v51 = vadd.f32 %v2362_v40, %v2385_v59 }
 0x38a   :  { %v988_v59 = vsel %vm2364_vm4, %v2466_v51, -1e+30 }
 0x38d   :  { %v906_v61 = vpop.f32.mrb[64].mxu1 }
 0x38e   :  { %v1857_v62 = vpop.f32.mrb[65].mxu1  ;;  %v2414_v20 = vadd.f32 %v2362_v40, %v906_v61 }
 0x38f   :  { %v2387_v63 = vpop.f32.mrb[66].mxu1 }
 0x390   :  { %v1858_v1 = vpop.f32.mrb[67].mxu1  ;;  %v989_v24 = vsel %vm2364_vm4, %v2414_v20, -1e+30 }
 0x395   :  { %v914_v2 = vpop.f32.mrb[68].mxu1 }
 0x396   :  { %v1861_v3 = vpop.f32.mrb[69].mxu1  ;;  %v2436_v35 = vadd.f32 %v2362_v40, %v914_v2 }
 0x397   :  { %v2389_v4 = vpop.f32.mrb[70].mxu1 }
 0x398   :  { %v1862_v5 = vpop.f32.mrb[71].mxu1  ;;  %v991_v56 = vsel %vm2364_vm4, %v2436_v35, -1e+30 }
 0x39c   :  { %1010 = vmax.xlane.f32.xlu1 %v983_v6  ;;  %v2487_v6 = vadd.f32 %v2362_v40, %v2387_v63 }
 0x39d   :  { %v922_v7 = vpop.f32.mrb[72].mxu1 }
 0x39e   :  { %v1865_v8 = vpop.f32.mrb[73].mxu1  ;;  %v2455_v48 = vadd.f32 %v2362_v40, %v922_v7 }
 0x39f   :  { %v2394_v9 = vpop.f32.mrb[74].mxu1 }
 0x3a0   :  { %v1866_v10 = vpop.f32.mrb[75].mxu1  ;;  %v993_v50 = vsel %vm2364_vm4, %v2455_v48, -1e+30 }
 0x3a5   :  { %v930_v13 = vpop.f32.mrb[76].mxu1 }
 0x3a6   :  { %1008 = vmax.xlane.f32.xlu0 %v982_v12  ;;  %v1869_v14 = vpop.f32.mrb[77].mxu1  ;;  %v2470_v57 = vadd.f32 %v2362_v40, %v930_v13 }
 0x3a7   :  { %v2408_v17 = vpop.f32.mrb[78].mxu1 }
 0x3a8   :  { %v1870_v18 = vpop.f32.mrb[79].mxu1 }
 0x3aa   :  { %1014 = vmax.xlane.f32.xlu0 %v985_v16 }
 0x3ad   :  { %1098 = vperm.xlu1 %1910, %v2411_v19   ;;  %v2420_v22 = vpop.f32.mrb[80].mxu1 }
 0x3ae   :  { %1018 = vmax.xlane.f32.xlu0 %v987_v21  ;;  %v1873_v23 = vpop.f32.mrb[81].mxu1  ;;  %v2494_v18 = vadd.f32 %v2362_v40, %v2420_v22 }
 0x3af   :  { %v2425_v25 = vpop.f32.mrb[82].mxu1 }
 0x3b0   :  { %v1874_v26 = vpop.f32.mrb[83].mxu1  ;;  %v997_v63 = vsel %vm2364_vm4, %v2494_v18, -1e+30 }
 0x3b2   :  { %1022 = vmax.xlane.f32.xlu0 %v989_v24 }
 0x3b5   :  { %v2427_v27 = vpop.f32.mrb[84].mxu1 }
 0x3b6   :  { %v1877_v28 = vpop.f32.mrb[85].mxu1 }
 0x3b7   :  { %v2429_v29 = vpop.f32.mrb[86].mxu1 }
 0x3b8   :  { %v1878_v30 = vpop.f32.mrb[87].mxu1 }
 0x3b9   :  { %v2514_v30 = vadd.f32 %v2362_v40, %v2427_v27  ;;  %v2528_v27 = vadd.f32 %v2362_v40, %v2394_v9 }
 0x3bd   :  { %v2431_v31 = vpop.f32.mrb[88].mxu1 }
 0x3be   :  { %v1881_v32 = vpop.f32.mrb[89].mxu1 }
 0x3bf   :  { %v2433_v33 = vpop.f32.mrb[90].mxu1 }
 0x3c0   :  { %v1882_v34 = vpop.f32.mrb[91].mxu1 }
 0x3c5   :  { %v2438_v36 = vpop.f32.mrb[92].mxu1 }
 0x3c6   :  { %v1885_v37 = vpop.f32.mrb[93].mxu1 }
 0x3c7   :  { %v2440_v38 = vpop.f32.mrb[94].mxu1 }
 0x3c8   :  { %1133 = vperm.xlu0 %1911, %v2436_v35   ;;  %v1886_v39 = vpop.f32.mrb[95].mxu1 }
 0x3cd   :  { %v2443_v41 = vpop.f32.mrb[96].mxu1 }
 0x3ce   :  { %v1889_v42 = vpop.f32.mrb[97].mxu1 }
 0x3cf   :  { %v973_v43 = vpop.f32.mrb[98].mxu1 }
 0x3d0   :  { %v1890_v45 = vpop.f32.mrb[99].mxu1 }
 0x3d1   :  { %1012 = vmax.xlane.f32.xlu1 %v984_v44  ;;  %v2533_v44 = vadd.f32 %v2362_v40, %v2431_v31  ;;  %v2549_v31 = vadd.f32 %v2362_v40, %v2408_v17 }
 0x3e2   :  { %1103 = vperm.xlu1 %1910, %v2397_v11  }
 0x3e6   :  { %1108 = vperm.xlu1 %1910, %v894_v53  }
 0x3e7   :  { %1026 = vmax.xlane.f32.xlu0 %v991_v56 }
 0x3ef   :  { %v1084_v62 = vpop.permute.xlu1 %1083 }
 0x3f7   :  { %v1094_v5 = vpop.permute.xlu1 %1093 }
 0x3fd   :  { %1143 = vperm.xlu0 %1911, %v2455_v48  }
 0x3fe   :  { %v1007_v52 = vpop.xlane.xlu0 %1006 }
 0x3ff   :  { %v1056_v58 = vsub.f32 %v2369_v0, %v1007_v52  ;;  %v995_v0 = vsel %vm2364_vm4, %v2470_v57, -1e+30  ;;  %v994_v52 = vsel %vm2364_vm4, %v2528_v27, -1e+30 }
 0x401   :  { %v1206_v1 = vadd.f32 %v1084_v62, %v1056_v58 }
 0x406   :  { %v1089_v54 = vpop.permute.xlu0 %1088 }
 0x40a   :  { %1016 = vmax.xlane.f32.xlu1 %v986_v49 }
 0x41b   :  { %1113 = vperm.xlu1 %1910, %v2403_v15  }
 0x41c   :  { %1030 = vmax.xlane.f32.xlu0 %v993_v50 }
 0x41f   :  { %1118 = vperm.xlu1 %1910, %v2466_v51  }
 0x432   :  { %1153 = vperm.xlu0 %1911, %v2470_v57  }
 0x433   :  { %v1009_v60 = vpop.xlane.xlu0 %1008 }
 0x434   :  { %v1057_v61 = vsub.f32 %v2382_v55, %v1009_v60  ;;  %v1011_v55 = vpop.xlane.xlu1 %1010 }
 0x435   :  { %v1058_v8 = vsub.f32 %v2376_v47, %v1011_v55  ;;  %v990_v47 = vsel %vm2364_vm4, %v2487_v6, -1e+30 }
 0x436   :  { %v1207_v2 = vadd.f32 %v1089_v54, %v1057_v61  ;;  %v2554_v54 = vadd.f32 %v2362_v40, %v2438_v36  ;;  %v996_v36 = vsel %vm2364_vm4, %v2549_v31, -1e+30 }
 0x437   :  { %v1208_v13 = vadd.f32 %v1094_v5, %v1058_v8  ;;  %v1015_v23 = vpop.xlane.xlu0 %1014  ;;  %v2567_v5 = vadd.f32 %v2362_v40, %v2443_v41 }
 0x438   :  { %v1488_v3 = vpack.c.bf16 %v1207_v2, %v1206_v1  ;;  %v1099_v7 = vpop.permute.xlu1 %1098  ;;  %v1060_v26 = vsub.f32 %v2397_v11, %v1015_v23  ;;  %v999_v11 = vsel %vm2364_vm4, %v2514_v30, -1e+30 }
 0x439   :  { %v1005_v55 = vsel %vm2364_vm4, %v2567_v5, -1e+30 }
 0x43a   :  { %1489 = vst [vmem:[%s2636_s4] sm:$0xff] %v1488_v3  }
 0x43b   :  { %v1019_v43 = vpop.xlane.xlu0 %1018 }
 0x43f   :  { %v1023_v60 = vpop.xlane.xlu0 %1022 }
 0x440   :  { %v1064_v62 = vsub.f32 %v2414_v20, %v1023_v60 }
 0x443   :  { %1020 = vmax.xlane.f32.xlu1 %v988_v59 }
 0x447   :  { %v1134_v59 = vpop.permute.xlu0 %1133 }
 0x451   :  { %1034 = vmax.xlane.f32.xlu0 %v995_v0 }
 0x454   :  { %1123 = vperm.xlu1 %1910, %v2414_v20   ;;  %v1003_v20 = vsel %vm2364_vm4, %v2554_v54, -1e+30 }
 0x458   :  { %1128 = vperm.xlu1 %1910, %v2487_v6  }
 0x45e   :  { %v1013_v10 = vpop.xlane.xlu1 %1012 }
 0x45f   :  { %v1059_v12 = vsub.f32 %v2411_v19, %v1013_v10  ;;  %v2508_v19 = vadd.f32 %v2362_v40, %v2389_v4 }
 0x461   :  { %v1209_v14 = vadd.f32 %v1099_v7, %v1059_v12  ;;  %v992_v4 = vsel %vm2364_vm4, %v2508_v19, -1e+30 }
 0x462   :  { %v1104_v21 = vpop.permute.xlu1 %1103 }
 0x463   :  { %v1493_v16 = vpack.c.bf16 %v1209_v14, %v1208_v13  ;;  %v1210_v32 = vadd.f32 %v1104_v21, %v1060_v26 }
 0x465   :  { %1545 = vst [vmem:[%s2636_s4 + $0x8] sm:$0xff] %v1493_v16  }
 0x466   :  { %v1109_v22 = vpop.permute.xlu1 %1108 }
 0x467   :  { %1163 = vperm.xlu0 %1911, %v2494_v18  }
 0x474   :  { %v1027_v0 = vpop.xlane.xlu0 %1026 }
 0x475   :  { %v1066_v14 = vsub.f32 %v2436_v35, %v1027_v0 }
 0x477   :  { %v1216_v21 = vadd.f32 %v1134_v59, %v1066_v14 }
 0x47c   :  { %1024 = vmax.xlane.f32.xlu1 %v990_v47  ;;  %v1144_v7 = vpop.permute.xlu0 %1143 }
 0x486   :  { %1038 = vmax.xlane.f32.xlu0 %v997_v63 }
 0x48d   :  { %1138 = vperm.xlu1 %1910, %v2508_v19  }
 0x497   :  { %v1017_v24 = vpop.xlane.xlu1 %1016 }
 0x498   :  { %v1061_v28 = vsub.f32 %v894_v53, %v1017_v24  ;;  %v1062_v53 = vsub.f32 %v2403_v15, %v1019_v43  ;;  %v1001_v15 = vsel %vm2364_vm4, %v2533_v44, -1e+30 }
 0x49a   :  { %v1211_v34 = vadd.f32 %v1109_v22, %v1061_v28 }
 0x49b   :  { %v1114_v39 = vpop.permute.xlu1 %1113 }
 0x49c   :  { %v1498_v37 = vpack.c.bf16 %v1211_v34, %v1210_v32  ;;  %1173 = vperm.xlu0 %1911, %v2514_v30   ;;  %v1212_v49 = vadd.f32 %v1114_v39, %v1062_v53 }
 0x49e   :  { %1546 = vst [vmem:[%s2636_s4 + $0x10] sm:$0xff] %v1498_v37  }
 0x49f   :  { %v1119_v42 = vpop.permute.xlu1 %1118 }
 0x4a9   :  { %v1031_v41 = vpop.xlane.xlu0 %1030 }
 0x4aa   :  { %v1068_v34 = vsub.f32 %v2455_v48, %v1031_v41  ;;  %v958_v48 = vadd.f32 %v2362_v40, %v2433_v33  ;;  %v966_v33 = vadd.f32 %v2362_v40, %v2440_v38 }
 0x4b1   :  { %1028 = vmax.xlane.f32.xlu1 %v992_v4  ;;  %v1154_v8 = vpop.permute.xlu0 %1153 }
 0x4bb   :  { %1042 = vmax.xlane.f32.xlu0 %v999_v11  ;;  %v1218_v11 = vadd.f32 %v1144_v7, %v1068_v34 }
 0x4c2   :  { %1148 = vperm.xlu1 %1910, %v2528_v27  }
 0x4d0   :  { %v1021_v45 = vpop.xlane.xlu1 %1020 }
 0x4d1   :  { %v1063_v56 = vsub.f32 %v2466_v51, %v1021_v45  ;;  %1183 = vperm.xlu0 %1911, %v2533_v44  }
 0x4d3   :  { %v1213_v50 = vadd.f32 %v1119_v42, %v1063_v56 }
 0x4d4   :  { %v1124_v51 = vpop.permute.xlu1 %1123 }
 0x4d5   :  { %v1503_v9 = vpack.c.bf16 %v1213_v50, %v1212_v49  ;;  %v1214_v2 = vadd.f32 %v1124_v51, %v1064_v62  ;;  %v1004_v62 = vsel %vm2364_vm4, %v966_v33, -1e+30 }
 0x4d7   :  { %1547 = vst [vmem:[%s2636_s4 + $0x18] sm:$0xff] %v1503_v9  }
 0x4d8   :  { %v1129_v58 = vpop.permute.xlu1 %1128 }
 0x4de   :  { %v1035_v10 = vpop.xlane.xlu0 %1034 }
 0x4df   :  { %v1070_v56 = vsub.f32 %v2470_v57, %v1035_v10  ;;  %v1002_v57 = vsel %vm2364_vm4, %v958_v48, -1e+30 }
 0x4e1   :  { %v1220_v9 = vadd.f32 %v1154_v8, %v1070_v56 }
 0x4e6   :  { %1032 = vmax.xlane.f32.xlu1 %v994_v52  ;;  %v1164_v13 = vpop.permute.xlu0 %1163 }
 0x4f0   :  { %1046 = vmax.xlane.f32.xlu0 %v1001_v15 }
 0x4f7   :  { %1158 = vperm.xlu1 %1910, %v2549_v31  }
 0x506   :  { %1193 = vperm.xlu0 %1911, %v2554_v54  }
 0x509   :  { %v1025_v61 = vpop.xlane.xlu1 %1024 }
 0x50a   :  { %v1065_v1 = vsub.f32 %v2487_v6, %v1025_v61  ;;  %v2577_v6 = vadd.f32 %v2362_v40, %v2425_v25 }
 0x50c   :  { %v1215_v3 = vadd.f32 %v1129_v58, %v1065_v1  ;;  %v998_v35 = vsel %vm2364_vm4, %v2577_v6, -1e+30 }
 0x50d   :  { %v1139_v12 = vpop.permute.xlu1 %1138 }
 0x50e   :  { %v1508_v17 = vpack.c.bf16 %v1215_v3, %v1214_v2 }
 0x510   :  { %1548 = vst [vmem:[%s2636_s4 + $0x20] sm:$0xff] %v1508_v17  }
 0x513   :  { %v1039_v63 = vpop.xlane.xlu0 %1038 }
 0x514   :  { %v1072_v38 = vsub.f32 %v2494_v18, %v1039_v63 }
 0x51b   :  { %1036 = vmax.xlane.f32.xlu1 %v996_v36  ;;  %v1174_v23 = vpop.permute.xlu0 %1173  ;;  %v1222_v36 = vadd.f32 %v1164_v13, %v1072_v38 }
 0x525   :  { %1050 = vmax.xlane.f32.xlu0 %v1003_v20 }
 0x529   :  { %1054 = vmax.xlane.f32.xlu0 %v1005_v55 }
 0x52c   :  { %1168 = vperm.xlu1 %1910, %v2577_v6  }
 0x53e   :  { %v1029_v16 = vpop.xlane.xlu1 %1028 }
 0x53f   :  { %v1067_v47 = vsub.f32 %v2508_v19, %v1029_v16  ;;  %1203 = vperm.xlu0 %1911, %v2567_v5   ;;  %v950_v19 = vadd.f32 %v2362_v40, %v2429_v29 }
 0x541   :  { %v1217_v22 = vadd.f32 %v1139_v12, %v1067_v47  ;;  %v1000_v29 = vsel %vm2364_vm4, %v950_v19, -1e+30 }
 0x542   :  { %v1149_v32 = vpop.permute.xlu1 %1148 }
 0x543   :  { %v1513_v25 = vpack.c.bf16 %v1217_v22, %v1216_v21 }
 0x545   :  { %1549 = vst [vmem:[%s2636_s4 + $0x28] sm:$0xff] %v1513_v25  }
 0x548   :  { %v1043_v24 = vpop.xlane.xlu0 %1042 }
 0x549   :  { %v1074_v26 = vsub.f32 %v2514_v30, %v1043_v24 }
 0x54b   :  { %v1224_v28 = vadd.f32 %v1174_v23, %v1074_v26 }
 0x550   :  { %1040 = vmax.xlane.f32.xlu1 %v998_v35  ;;  %v1184_v30 = vpop.permute.xlu0 %1183 }
 0x561   :  { %1178 = vperm.xlu1 %1910, %v950_v19  }
 0x573   :  { %v1033_v37 = vpop.xlane.xlu1 %1032 }
 0x574   :  { %v1069_v4 = vsub.f32 %v2528_v27, %v1033_v37 }
 0x576   :  { %v1219_v39 = vadd.f32 %v1149_v32, %v1069_v4 }
 0x577   :  { %v1159_v27 = vpop.permute.xlu1 %1158 }
 0x578   :  { %v1518_v42 = vpack.c.bf16 %v1219_v39, %v1218_v11 }
 0x57a   :  { %1550 = vst [vmem:[%s2636_s4 + $0x30] sm:$0xff] %v1518_v42  }
 0x57d   :  { %v1047_v43 = vpop.xlane.xlu0 %1046 }
 0x57e   :  { %v1076_v45 = vsub.f32 %v2533_v44, %v1047_v43 }
 0x580   :  { %v1226_v53 = vadd.f32 %v1184_v30, %v1076_v45 }
 0x585   :  { %1044 = vmax.xlane.f32.xlu1 %v1000_v29  ;;  %v1194_v51 = vpop.permute.xlu0 %1193 }
 0x596   :  { %1188 = vperm.xlu1 %1910, %v958_v48  }
 0x5a8   :  { %v1037_v49 = vpop.xlane.xlu1 %1036 }
 0x5a9   :  { %v1071_v50 = vsub.f32 %v2549_v31, %v1037_v49 }
 0x5ab   :  { %v1221_v52 = vadd.f32 %v1159_v27, %v1071_v50 }
 0x5ac   :  { %v1169_v40 = vpop.permute.xlu1 %1168 }
 0x5ad   :  { %v1523_v15 = vpack.c.bf16 %v1221_v52, %v1220_v9 }
 0x5af   :  { %1551 = vst [vmem:[%s2636_s4 + $0x38] sm:$0xff] %v1523_v15  }
 0x5b2   :  { %v1051_v44 = vpop.xlane.xlu0 %1050 }
 0x5b3   :  { %v1078_v58 = vsub.f32 %v2554_v54, %v1051_v44 }
 0x5b5   :  { %v1228_v60 = vadd.f32 %v1194_v51, %v1078_v58 }
 0x5b6   :  { %v1055_v61 = vpop.xlane.xlu0 %1054 }
 0x5b7   :  { %v1080_v31 = vsub.f32 %v2567_v5, %v1055_v61 }
 0x5ba   :  { %1048 = vmax.xlane.f32.xlu1 %v1002_v57 }
 0x5be   :  { %1052 = vmax.xlane.f32.xlu1 %v1004_v62  ;;  %v1204_v1 = vpop.permute.xlu0 %1203 }
 0x5bf   :  { %v1230_v2 = vadd.f32 %v1204_v1, %v1080_v31 }
 0x5c1   :  { %v1484_v3 = vpack.c.bf16 %v1230_v2, %v1230_v2 }
 0x5c3   :  { %1356 = vst [vmem:[%s2636_s4 + $0x60] sm:$0xf] %v1484_v3 }
 0x5cf   :  { %1198 = vperm.xlu1 %1910, %v966_v33  }
 0x5dd   :  { %v1041_v54 = vpop.xlane.xlu1 %1040 }
 0x5de   :  { %v1073_v17 = vsub.f32 %v2577_v6, %v1041_v54 }
 0x5e0   :  { %v1223_v59 = vadd.f32 %v1169_v40, %v1073_v17 }
 0x5e1   :  { %v1179_v46 = vpop.permute.xlu1 %1178 }
 0x5e2   :  { %v1528_v5 = vpack.c.bf16 %v1223_v59, %v1222_v36 }
 0x5e4   :  { %1552 = vst [vmem:[%s2636_s4 + $0x40] sm:$0xff] %v1528_v5  }
 0x612   :  { %v1045_v20 = vpop.xlane.xlu1 %1044 }
 0x613   :  { %v1075_v0 = vsub.f32 %v950_v19, %v1045_v20 }
 0x615   :  { %v1225_v55 = vadd.f32 %v1179_v46, %v1075_v0 }
 0x616   :  { %v1189_v18 = vpop.permute.xlu1 %1188 }
 0x617   :  { %v1533_v7 = vpack.c.bf16 %v1225_v55, %v1224_v28 }
 0x619   :  { %1553 = vst [vmem:[%s2636_s4 + $0x48] sm:$0xff] %v1533_v7  }
 0x647   :  { %v1049_v41 = vpop.xlane.xlu1 %1048 }
 0x648   :  { %v1077_v8 = vsub.f32 %v958_v48, %v1049_v41 }
 0x64a   :  { %v1227_v6 = vadd.f32 %v1189_v18, %v1077_v8 }
 0x64b   :  { %v1053_v10 = vpop.xlane.xlu1 %1052 }
 0x64c   :  { %v1538_v12 = vpack.c.bf16 %v1227_v6, %v1226_v53  ;;  %v1079_v13 = vsub.f32 %v966_v33, %v1053_v10 }
 0x64e   :  { %1554 = vst [vmem:[%s2636_s4 + $0x50] sm:$0xff] %v1538_v12  }
 0x64f   :  { %v1199_v14 = vpop.permute.xlu1 %1198 }
 0x650   :  { %v1229_v16 = vadd.f32 %v1199_v14, %v1079_v13 }
 0x652   :  { %v1543_v47 = vpack.c.bf16 %v1229_v16, %v1228_v60 }
 0x654   :  { %1555 = vst [vmem:[%s2636_s4 + $0x58] sm:$0xff] %v1543_v47  }

</bundles_post_ra>
